<compile_context>
chip_gen: v7x
topology: tpu7x:2x2x1
jax: 0.10.0
libtpu: 0.0.40
codegen_flags: <defaults>
</compile_context>

<pallas_src>
import math

import jax
import jax.numpy as jnp
from jax import lax
from jax.experimental import pallas as pl
from jax.experimental.pallas import tpu as pltpu

OUT_COLS = 8 * 4674          # 37392 logical output columns of the head
OUT_COLS_PAD = 296 * 128     # 37888: lane-aligned AND evenly tileable
TILE_N = 37 * 128            # 4736  -> 8 column tiles of the dominant matmul


# ----------------------------- fused forward kernel ---------------------------
def make_fused_kernel(nq, nd, hq, hd, o):
    """nq/nd node counts, hq/hd GIN hidden dims, o = out_dim (static)."""
    n_tot = nq + nd
    hs = hq + hd                 # merged GIN hidden width

    def kernel(adj_ref, gmask_ref, x_ref,
               gw11_ref, gw12_ref, gw21_ref, gw22_ref, gb_ref,
               gatw_ref, gatv_ref,
               w1_ref, hb_ref, w2_ref, w3_ref,
               w4_ref, b4_ref,
               pred_ref, qout_ref, dout_ref,
               h3_scr):
        # -------- prologue (grid step 0 only): GIN + GAT + pool + head 1..3 --
        @pl.when(pl.program_id(0) == 0)
        def _prologue():
            x = x_ref[...]                       # [N, in]   (query || data)
            a = adj_ref[...]                     # [N, N]    block-diag GIN adj
            gb = gb_ref[...]

            # ---- merged GIN over the combined node set (single chain) -------
            agg = x + jnp.dot(a, x, preferred_element_type=jnp.float32)
            h = jnp.dot(agg, gw11_ref[...], preferred_element_type=jnp.float32)
            h = jnp.maximum(h + gb[0:1, :hs], 0.0)
            h = jnp.dot(h, gw12_ref[...], preferred_element_type=jnp.float32)
            h = jnp.maximum(h + gb[1:2, :hs], 0.0)          # ReLU between convs
            agg2 = h + jnp.dot(a, h, preferred_element_type=jnp.float32)
            h = jnp.dot(agg2, gw21_ref[...], preferred_element_type=jnp.float32)
            h = jnp.maximum(h + gb[2:3, :hs], 0.0)
            # zero the "wrong" half of every row before the stacked last layer
            r = lax.broadcasted_iota(jnp.int32, (n_tot, hs), 0)
            c = lax.broadcasted_iota(jnp.int32, (n_tot, hs), 1)
            h = jnp.where((r < nq) == (c < hq), h, 0.0)
            emb = jnp.dot(h, gw22_ref[...], preferred_element_type=jnp.float32)
            ro = lax.broadcasted_iota(jnp.int32, (n_tot, o), 0)
            emb = emb + jnp.where(ro < nq, gb[3:4, :o], gb[4:5, :o])
            qout_ref[...] = emb[:nq, :]                      # query_x_1
            dout_ref[...] = emb[nq:, :]                      # data_x_2

            # ---- single-head GAT on the raw concatenated input features -----
            hg = jnp.dot(x, gatw_ref[...], preferred_element_type=jnp.float32)
            gatv = gatv_ref[...]                             # [3, o]
            s_dst = jnp.sum(hg * gatv[0:1, :], axis=-1, keepdims=True)  # [N,1]
            s_src = jnp.sum(hg * gatv[1:2, :], axis=-1, keepdims=True)  # [N,1]
            # broadcast s_src along rows without a transpose:
            # ones @ diag(s_src) -> every row = [s_src_0 .. s_src_{N-1}]
            eye = (lax.broadcasted_iota(jnp.int32, (n_tot, n_tot), 0)
                   == lax.broadcasted_iota(jnp.int32, (n_tot, n_tot), 1)
                   ).astype(jnp.float32)
            src_row = jnp.dot(jnp.ones((n_tot, n_tot), jnp.float32),
                              s_src * eye, preferred_element_type=jnp.float32)
            e = s_dst + src_row               # e[i,j] = a_dst.h_i + a_src.h_j
            e = jnp.where(e > 0.0, e, 0.2 * e)               # LeakyReLU(0.2)
            gmask = gmask_ref[...]
            e = jnp.where(gmask > 0.0, e, jnp.float32(-1e30))
            m = jnp.max(e, axis=1, keepdims=True)
            p = jnp.exp(e - m) * gmask
            alpha = p / jnp.sum(p, axis=1, keepdims=True)    # exact reciprocal
            g = (jnp.dot(alpha, hg, preferred_element_type=jnp.float32)
                 + gatv[2:3, :])

            # ---- sum pooling (feature-concat commutes with sum-pool) --------
            pq = jnp.sum(emb[:nq, :], axis=0, keepdims=True)   # pool(query_x)
            pd = jnp.sum(emb[nq:, :], axis=0, keepdims=True)   # pool(data_x)
            pqd = jnp.sum(g[:nq, :], axis=0, keepdims=True)    # pool(q with d)
            pdq = jnp.sum(g[nq:, :], axis=0, keepdims=True)    # pool(d with q)

            # ---- head: Linear(4o,2o), Linear(2o,o), ReLU, Linear(o,o/2), ReLU
            w1 = w1_ref[...]
            hb = hb_ref[...]
            h1 = (jnp.dot(pq, w1[0 * o:1 * o, :], preferred_element_type=jnp.float32)
                  + jnp.dot(pqd, w1[1 * o:2 * o, :], preferred_element_type=jnp.float32)
                  + jnp.dot(pd, w1[2 * o:3 * o, :], preferred_element_type=jnp.float32)
                  + jnp.dot(pdq, w1[3 * o:4 * o, :], preferred_element_type=jnp.float32)
                  + hb[0:1, :])
            h2 = jnp.dot(h1, w2_ref[...], preferred_element_type=jnp.float32)
            h2 = jnp.maximum(h2 + hb[1:2, :o], 0.0)
            h3 = jnp.dot(h2, w3_ref[...], preferred_element_type=jnp.float32)
            h3 = jnp.maximum(h3 + hb[2:3, :o // 2], 0.0)
            h3_scr[...] = h3                                 # [1, o//2]

        # -------- per-tile epilogue: dominant matmul, pipelined w4 stream ----
        h3v = h3_scr[...].astype(jnp.bfloat16)
        h4 = jnp.dot(h3v, w4_ref[...],
                     preferred_element_type=jnp.float32) + b4_ref[...]
        pred_ref[...] = jnp.maximum(h4, 0.0)

    return kernel


# ----------------------------- host-side param packing ------------------------
def _block_diag(a, b):
    za = jnp.zeros((a.shape[0], b.shape[1]), a.dtype)
    zb = jnp.zeros((b.shape[0], a.shape[1]), b.dtype)
    return jnp.concatenate(
        [jnp.concatenate([a, za], axis=1),
         jnp.concatenate([zb, b], axis=1)], axis=0)


def _pack_gin(qg, dg):
    """Merge both GIN encoders into one block-structured weight set."""
    hq = qg["w11"].shape[1]
    hd = dg["w11"].shape[1]
    o = qg["w22"].shape[1]
    hs = hq + hd
    gw11 = jnp.concatenate([qg["w11"], dg["w11"]], axis=1)           # [in, hs]
    gw12 = _block_diag(qg["w12"], dg["w12"])                         # [hs, hs]
    gw21 = _block_diag(qg["w21"], dg["w21"])                         # [hs, hs]
    gw22 = jnp.concatenate([qg["w22"], dg["w22"]], axis=0)           # [hs, o]
    bw = max(hs, o)

    def pad_row(v):
        return jnp.pad(v, ((0, 0), (0, bw - v.shape[1])))

    gb = jnp.concatenate([
        pad_row(jnp.concatenate([qg["b11"], dg["b11"]], axis=1)),
        pad_row(jnp.concatenate([qg["b12"], dg["b12"]], axis=1)),
        pad_row(jnp.concatenate([qg["b21"], dg["b21"]], axis=1)),
        pad_row(qg["b22"]),
        pad_row(dg["b22"]),
    ], axis=0)                                                       # [5, bw]
    return gw11, gw12, gw21, gw22, gb, hq, hd, o


def _pack_head_biases(head, o):
    b1 = head["b1"]                                                  # [1, 2o]
    b2 = jnp.pad(head["b2"], ((0, 0), (0, 2 * o - o)))
    b3 = jnp.pad(head["b3"], ((0, 0), (0, 2 * o - o // 2)))
    return jnp.concatenate([b1, b2, b3], axis=0)                     # [3, 2o]


# ------------------------------- forward wrapper -------------------------------
def attentive_count_net_forward(params, query_in_feat, data_in_feat,
                                query_adj, data_adj, q2d_mask):
    nq = query_in_feat.shape[0]
    nd = data_in_feat.shape[0]
    n_tot = nq + nd
    # TODO(synk): for general graph sizes pad node counts to multiples of 8
    # (zero rows in features / adjacency / mask); example sizes are aligned.
    assert nq % 8 == 0 and nd % 8 == 0, "node counts must be multiples of 8"

    qg, dg = params["query_gin"], params["data_gin"]
    gat, head = params["gat"], params["head"]

    gw11, gw12, gw21, gw22, gb, hq, hd, o = _pack_gin(qg, dg)
    gatv = jnp.concatenate([gat["a_dst"], gat["a_src"], gat["b"]], axis=0)
    hb = _pack_head_biases(head, o)

    # combined (query || data) graph: block-diag GIN adjacency, shared features
    x_cat = jnp.concatenate([query_in_feat, data_in_feat], axis=0)
    adj_bd = jnp.zeros((n_tot, n_tot), jnp.float32)
    adj_bd = adj_bd.at[:nq, :nq].set(query_adj).at[nq:, nq:].set(data_adj)

    args = (adj_bd, q2d_mask, x_cat,
            gw11, gw12, gw21, gw22, gb,
            gat["w"], gatv,
            head["w1"], hb, head["w2"], head["w3"],
            head["w4"], head["b4"])

    def whole(arr):
        nd_ = arr.ndim
        return pl.BlockSpec(tuple(arr.shape), lambda j, _n=nd_: (0,) * _n)

    grid = (OUT_COLS_PAD // TILE_N,)
    in_specs = [whole(a) for a in args[:-2]] + [
        pl.BlockSpec((o // 2, TILE_N), lambda j: (0, j)),   # w4 (bf16) streamed
        pl.BlockSpec((1, TILE_N), lambda j: (0, j)),        # b4 streamed
    ]
    out_specs = (
        pl.BlockSpec((1, TILE_N), lambda j: (0, j)),        # pred tiles
        pl.BlockSpec((nq, o), lambda j: (0, 0)),            # query_x_1 resident
        pl.BlockSpec((nd, o), lambda j: (0, 0)),            # data_x_2 resident
    )
    out_shapes = (
        jax.ShapeDtypeStruct((1, OUT_COLS_PAD), jnp.float32),
        jax.ShapeDtypeStruct((nq, o), jnp.float32),
        jax.ShapeDtypeStruct((nd, o), jnp.float32),
    )

    # advisory cost estimate (dominated by [1, o/2] @ [o/2, OUT_COLS_PAD])
    flops = int(2 * (o // 2) * OUT_COLS_PAD
                + 6 * n_tot * (hq + hd) * (hq + hd)
                + 4 * n_tot * n_tot * o
                + 2 * 4 * o * 2 * o)
    transcendentals = int(n_tot * n_tot)
    bytes_accessed = int(sum(int(a.size) * a.dtype.itemsize for a in args)
                         + sum(math.prod(s.shape) * jnp.dtype(s.dtype).itemsize
                               for s in out_shapes))

    pred_pad, query_x, data_x = pl.pallas_call(
        make_fused_kernel(nq, nd, hq, hd, o),
        grid=grid,
        out_shape=out_shapes,
        in_specs=in_specs,
        out_specs=out_specs,
        scratch_shapes=[pltpu.VMEM((1, o // 2), jnp.float32)],
        compiler_params=pltpu.CompilerParams(
            dimension_semantics=("arbitrary",)),
        cost_estimate=pl.CostEstimate(flops=flops,
                                      transcendentals=transcendentals,
                                      bytes_accessed=bytes_accessed),
    )(*args)

    pred = pred_pad[0, :OUT_COLS].reshape(8, 4674)
    return pred, query_x, data_x


# ------------------------------- glue / params ---------------------------------
def edges_to_adj(edge_index, n, symmetric=True, self_loops=False):
    src, dst = edge_index[0], edge_index[1]
    adj = jnp.zeros((n, n), jnp.float32).at[dst, src].set(1.0)
    if symmetric:
        adj = jnp.maximum(adj, adj.T)
    if self_loops:
        adj = jnp.maximum(adj, jnp.eye(n, dtype=jnp.float32))
    return adj


def _linear(key, fan_in, fan_out):
    kw, kb = jax.random.split(key)
    scale = 1.0 / jnp.sqrt(jnp.float32(fan_in))
    w = jax.random.normal(kw, (fan_in, fan_out), jnp.float32) * scale
    b = jax.random.normal(kb, (1, fan_out), jnp.float32) * 0.01
    return w, b


def make_gin_params(key, in_dim, hidden_dim, out_dim):
    ks = jax.random.split(key, 4)
    w11, b11 = _linear(ks[0], in_dim, hidden_dim)
    w12, b12 = _linear(ks[1], hidden_dim, hidden_dim)
    w21, b21 = _linear(ks[2], hidden_dim, hidden_dim)
    w22, b22 = _linear(ks[3], hidden_dim, out_dim)
    return dict(w11=w11, b11=b11, w12=w12, b12=b12,
                w21=w21, b21=b21, w22=w22, b22=b22)


def make_gat_params(key, in_dim, out_dim):
    kw, ka, kb = jax.random.split(key, 3)
    w, _ = _linear(kw, in_dim, out_dim)
    a_src = jax.random.normal(ka, (1, out_dim), jnp.float32) * 0.1
    a_dst = jax.random.normal(kb, (1, out_dim), jnp.float32) * 0.1
    b = jnp.zeros((1, out_dim), jnp.float32)     # GATConv bias (PyG default)
    return dict(w=w, a_src=a_src, a_dst=a_dst, b=b)


def make_head_params(key, out_dim):
    ks = jax.random.split(key, 4)
    w1, b1 = _linear(ks[0], 4 * out_dim, 2 * out_dim)
    w2, b2 = _linear(ks[1], 2 * out_dim, out_dim)
    w3, b3 = _linear(ks[2], out_dim, out_dim // 2)
    w4, b4 = _linear(ks[3], out_dim // 2, OUT_COLS)
    # pad the dominant layer to an evenly-tileable lane multiple; bf16 weights
    # halve its HBM/VMEM footprint while f32 accumulation is kept in-kernel.
    pad = OUT_COLS_PAD - OUT_COLS
    w4 = jnp.pad(w4, ((0, 0), (0, pad))).astype(jnp.bfloat16)
    b4 = jnp.pad(b4, ((0, 0), (0, pad)))
    return dict(w1=w1, b1=b1, w2=w2, b2=b2, w3=w3, b3=b3, w4=w4, b4=b4)


if __name__ == "__main__":
    input_feat_dim = 16
    query_hidden_dim = 32
    data_hidden_dim = 32
    out_dim = 32
    num_query = 8
    num_data = 16

    key = jax.random.PRNGKey(0)
    kq, kd, kp1, kp2, kp3, kp4 = jax.random.split(key, 6)

    query_in_feat = jax.random.normal(kq, (num_query, input_feat_dim), jnp.float32)
    data_in_feat = jax.random.normal(kd, (num_data, input_feat_dim), jnp.float32)

    # deterministic ring edge lists ([2, E], row0=src, row1=dst)
    q_idx = jnp.arange(num_query, dtype=jnp.int32)
    query_edge_list = jnp.stack([q_idx, (q_idx + 1) % num_query])
    d_idx = jnp.arange(num_data, dtype=jnp.int32)
    data_edge_list = jnp.stack([d_idx, (d_idx + 1) % num_data])
    q2d_edge_list = jnp.stack([q_idx, num_query + (q_idx % num_data)])

    # dense adjacency glue: GIN uses symmetric adjacency, GAT mask adds
    # self loops (PyG GATConv default).
    query_adj = edges_to_adj(query_edge_list, num_query, symmetric=True)
    data_adj = edges_to_adj(data_edge_list, num_data, symmetric=True)
    q2d_mask = edges_to_adj(q2d_edge_list, num_query + num_data,
                            symmetric=True, self_loops=True)

    params = dict(
        query_gin=make_gin_params(kp1, input_feat_dim, query_hidden_dim, out_dim),
        data_gin=make_gin_params(kp2, input_feat_dim, data_hidden_dim, out_dim),
        gat=make_gat_params(kp3, input_feat_dim, out_dim),
        head=make_head_params(kp4, out_dim),
    )

    pred, query_x_1, data_x_2 = attentive_count_net_forward(
        params, query_in_feat, data_in_feat, query_adj, data_adj, q2d_mask)
    jax.block_until_ready((pred, query_x_1, data_x_2))

    assert pred.shape == (8, 4674)
    assert query_x_1.shape == (num_query, out_dim)
    assert data_x_2.shape == (num_data, out_dim)
    assert bool(jnp.all(jnp.isfinite(pred)))
    print("KERNEL_OK")
</pallas_src>

<mosaic_0001>
module attributes {stable_mosaic.version = 11 : i64} {
  func.func @kernel(%arg0: i32, %arg1: memref<24x24xf32, #tpu.memory_space<vmem>>, %arg2: memref<24x24xf32, #tpu.memory_space<vmem>>, %arg3: memref<24x16xf32, #tpu.memory_space<vmem>>, %arg4: memref<16x64xf32, #tpu.memory_space<vmem>>, %arg5: memref<64x64xf32, #tpu.memory_space<vmem>>, %arg6: memref<64x64xf32, #tpu.memory_space<vmem>>, %arg7: memref<64x32xf32, #tpu.memory_space<vmem>>, %arg8: memref<5x64xf32, #tpu.memory_space<vmem>>, %arg9: memref<16x32xf32, #tpu.memory_space<vmem>>, %arg10: memref<3x32xf32, #tpu.memory_space<vmem>>, %arg11: memref<128x64xf32, #tpu.memory_space<vmem>>, %arg12: memref<3x64xf32, #tpu.memory_space<vmem>>, %arg13: memref<64x32xf32, #tpu.memory_space<vmem>>, %arg14: memref<32x16xf32, #tpu.memory_space<vmem>>, %arg15: memref<16x4736xbf16, #tpu.memory_space<vmem>>, %arg16: memref<1x4736xf32, #tpu.memory_space<vmem>>, %arg17: memref<1x4736xf32, #tpu.memory_space<vmem>>, %arg18: memref<8x32xf32, #tpu.memory_space<vmem>>, %arg19: memref<16x32xf32, #tpu.memory_space<vmem>>, %arg20: memref<1x16xf32, #tpu.memory_space<vmem>>) attributes {dimension_semantics = [#tpu.dimension_semantics<arbitrary>], iteration_bounds = array<i64: 8>, scalar_prefetch = 0 : i64, scratch_operands = 1 : i64, tpu.core_type = #tpu.core_type<tc>, window_params = [{pipeline_mode = #tpu.pipeline_mode<synchronous>, transform_indices = @transform_0, window_bounds = array<i64: 24, 24>}, {pipeline_mode = #tpu.pipeline_mode<synchronous>, transform_indices = @transform_1, window_bounds = array<i64: 24, 24>}, {pipeline_mode = #tpu.pipeline_mode<synchronous>, transform_indices = @transform_2, window_bounds = array<i64: 24, 16>}, {pipeline_mode = #tpu.pipeline_mode<synchronous>, transform_indices = @transform_3, window_bounds = array<i64: 16, 64>}, {pipeline_mode = #tpu.pipeline_mode<synchronous>, transform_indices = @transform_4, window_bounds = array<i64: 64, 64>}, {pipeline_mode = #tpu.pipeline_mode<synchronous>, transform_indices = @transform_5, window_bounds = array<i64: 64, 64>}, {pipeline_mode = #tpu.pipeline_mode<synchronous>, transform_indices = @transform_6, window_bounds = array<i64: 64, 32>}, {pipeline_mode = #tpu.pipeline_mode<synchronous>, transform_indices = @transform_7, window_bounds = array<i64: 5, 64>}, {pipeline_mode = #tpu.pipeline_mode<synchronous>, transform_indices = @transform_8, window_bounds = array<i64: 16, 32>}, {pipeline_mode = #tpu.pipeline_mode<synchronous>, transform_indices = @transform_9, window_bounds = array<i64: 3, 32>}, {pipeline_mode = #tpu.pipeline_mode<synchronous>, transform_indices = @transform_10, window_bounds = array<i64: 128, 64>}, {pipeline_mode = #tpu.pipeline_mode<synchronous>, transform_indices = @transform_11, window_bounds = array<i64: 3, 64>}, {pipeline_mode = #tpu.pipeline_mode<synchronous>, transform_indices = @transform_12, window_bounds = array<i64: 64, 32>}, {pipeline_mode = #tpu.pipeline_mode<synchronous>, transform_indices = @transform_13, window_bounds = array<i64: 32, 16>}, {transform_indices = @transform_14, window_bounds = array<i64: 16, 4736>}, {transform_indices = @transform_15, window_bounds = array<i64: 1, 4736>}, {transform_indices = @transform_16, window_bounds = array<i64: 1, 4736>}, {pipeline_mode = #tpu.pipeline_mode<synchronous>, transform_indices = @transform_17, window_bounds = array<i64: 8, 32>}, {pipeline_mode = #tpu.pipeline_mode<synchronous>, transform_indices = @transform_18, window_bounds = array<i64: 16, 32>}]} {
    %c0_i32 = arith.constant 0 : i32
    %0 = arith.cmpi eq, %arg0, %c0_i32 : i32
    %1 = arith.extui %0 : i1 to i32
    %c0_i32_0 = arith.constant 0 : i32
    %2 = arith.cmpi ne, %1, %c0_i32_0 : i32
    scf.if %2 {
      %c0_9 = arith.constant 0 : index
      %c0_10 = arith.constant 0 : index
      %12 = vector.load %arg3[%c0_9, %c0_10] : memref<24x16xf32, #tpu.memory_space<vmem>>, vector<24x16xf32>
      %c0_11 = arith.constant 0 : index
      %c0_12 = arith.constant 0 : index
      %13 = vector.load %arg1[%c0_11, %c0_12] : memref<24x24xf32, #tpu.memory_space<vmem>>, vector<24x24xf32>
      %c0_13 = arith.constant 0 : index
      %c0_14 = arith.constant 0 : index
      %14 = vector.load %arg8[%c0_13, %c0_14] : memref<5x64xf32, #tpu.memory_space<vmem>>, vector<5x64xf32>
      %cst_15 = arith.constant dense<0.000000e+00> : vector<24x16xf32>
      %15 = tpu.matmul %13, %12, %cst_15 {dimension_numbers = #tpu.dot_dimension_numbers<[1], [0], [0], [1], [0, 0, 1, 1], [], []>} : vector<24x24xf32>, vector<24x16xf32>, vector<24x16xf32> -> vector<24x16xf32>
      %16 = arith.addf %12, %15 : vector<24x16xf32>
      %c0_16 = arith.constant 0 : index
      %c0_17 = arith.constant 0 : index
      %17 = vector.load %arg4[%c0_16, %c0_17] : memref<16x64xf32, #tpu.memory_space<vmem>>, vector<16x64xf32>
      %cst_18 = arith.constant dense<0.000000e+00> : vector<24x64xf32>
      %18 = tpu.matmul %16, %17, %cst_18 {dimension_numbers = #tpu.dot_dimension_numbers<[1], [0], [0], [1], [0, 0, 1, 1], [], []>} : vector<24x16xf32>, vector<16x64xf32>, vector<24x64xf32> -> vector<24x64xf32>
      %19 = vector.extract_strided_slice %14 {offsets = [0, 0], sizes = [1, 64], strides = [1, 1]} : vector<5x64xf32> to vector<1x64xf32>
      %20 = vector.broadcast %19 : vector<1x64xf32> to vector<24x64xf32>
      %21 = arith.addf %18, %20 : vector<24x64xf32>
      %cst_19 = arith.constant 0.000000e+00 : f32
      %22 = vector.broadcast %cst_19 : f32 to vector<24x64xf32>
      %23 = arith.maximumf %21, %22 : vector<24x64xf32>
      %c0_20 = arith.constant 0 : index
      %c0_21 = arith.constant 0 : index
      %24 = vector.load %arg5[%c0_20, %c0_21] : memref<64x64xf32, #tpu.memory_space<vmem>>, vector<64x64xf32>
      %cst_22 = arith.constant dense<0.000000e+00> : vector<24x64xf32>
      %25 = tpu.matmul %23, %24, %cst_22 {dimension_numbers = #tpu.dot_dimension_numbers<[1], [0], [0], [1], [0, 0, 1, 1], [], []>} : vector<24x64xf32>, vector<64x64xf32>, vector<24x64xf32> -> vector<24x64xf32>
      %26 = vector.extract_strided_slice %14 {offsets = [1, 0], sizes = [1, 64], strides = [1, 1]} : vector<5x64xf32> to vector<1x64xf32>
      %27 = vector.broadcast %26 : vector<1x64xf32> to vector<24x64xf32>
      %28 = arith.addf %25, %27 : vector<24x64xf32>
      %cst_23 = arith.constant 0.000000e+00 : f32
      %29 = vector.broadcast %cst_23 : f32 to vector<24x64xf32>
      %30 = arith.maximumf %28, %29 : vector<24x64xf32>
      %cst_24 = arith.constant dense<0.000000e+00> : vector<24x64xf32>
      %31 = tpu.matmul %13, %30, %cst_24 {dimension_numbers = #tpu.dot_dimension_numbers<[1], [0], [0], [1], [0, 0, 1, 1], [], []>} : vector<24x24xf32>, vector<24x64xf32>, vector<24x64xf32> -> vector<24x64xf32>
      %32 = arith.addf %30, %31 : vector<24x64xf32>
      %c0_25 = arith.constant 0 : index
      %c0_26 = arith.constant 0 : index
      %33 = vector.load %arg6[%c0_25, %c0_26] : memref<64x64xf32, #tpu.memory_space<vmem>>, vector<64x64xf32>
      %cst_27 = arith.constant dense<0.000000e+00> : vector<24x64xf32>
      %34 = tpu.matmul %32, %33, %cst_27 {dimension_numbers = #tpu.dot_dimension_numbers<[1], [0], [0], [1], [0, 0, 1, 1], [], []>} : vector<24x64xf32>, vector<64x64xf32>, vector<24x64xf32> -> vector<24x64xf32>
      %35 = vector.extract_strided_slice %14 {offsets = [2, 0], sizes = [1, 64], strides = [1, 1]} : vector<5x64xf32> to vector<1x64xf32>
      %36 = vector.broadcast %35 : vector<1x64xf32> to vector<24x64xf32>
      %37 = arith.addf %34, %36 : vector<24x64xf32>
      %cst_28 = arith.constant 0.000000e+00 : f32
      %38 = vector.broadcast %cst_28 : f32 to vector<24x64xf32>
      %39 = arith.maximumf %37, %38 : vector<24x64xf32>
      %40 = tpu.iota {dimensions = array<i32: 0>} : vector<24x64xi32>
      %41 = tpu.iota {dimensions = array<i32: 1>} : vector<24x64xi32>
      %c8_i32 = arith.constant 8 : i32
      %42 = vector.broadcast %c8_i32 : i32 to vector<24x64xi32>
      %43 = arith.cmpi slt, %40, %42 : vector<24x64xi32>
      %c32_i32 = arith.constant 32 : i32
      %44 = vector.broadcast %c32_i32 : i32 to vector<24x64xi32>
      %45 = arith.cmpi slt, %41, %44 : vector<24x64xi32>
      %46 = arith.xori %43, %45 : vector<24x64xi1>
      %cst_29 = arith.constant dense<true> : vector<24x64xi1>
      %47 = arith.xori %46, %cst_29 : vector<24x64xi1>
      %cst_30 = arith.constant 0.000000e+00 : f32
      %48 = vector.broadcast %cst_30 : f32 to vector<24x64xf32>
      %49 = arith.select %47, %39, %48 : vector<24x64xi1>, vector<24x64xf32>
      %c0_31 = arith.constant 0 : index
      %c0_32 = arith.constant 0 : index
      %50 = vector.load %arg7[%c0_31, %c0_32] : memref<64x32xf32, #tpu.memory_space<vmem>>, vector<64x32xf32>
      %cst_33 = arith.constant dense<0.000000e+00> : vector<24x32xf32>
      %51 = tpu.matmul %49, %50, %cst_33 {dimension_numbers = #tpu.dot_dimension_numbers<[1], [0], [0], [1], [0, 0, 1, 1], [], []>} : vector<24x64xf32>, vector<64x32xf32>, vector<24x32xf32> -> vector<24x32xf32>
      %52 = tpu.iota {dimensions = array<i32: 0>} : vector<24x32xi32>
      %c8_i32_34 = arith.constant 8 : i32
      %53 = vector.broadcast %c8_i32_34 : i32 to vector<24x32xi32>
      %54 = arith.cmpi slt, %52, %53 : vector<24x32xi32>
      %55 = vector.extract_strided_slice %14 {offsets = [3, 0], sizes = [1, 32], strides = [1, 1]} : vector<5x64xf32> to vector<1x32xf32>
      %56 = vector.extract_strided_slice %14 {offsets = [4, 0], sizes = [1, 32], strides = [1, 1]} : vector<5x64xf32> to vector<1x32xf32>
      %57 = vector.shape_cast %55 : vector<1x32xf32> to vector<1x32xf32>
      %58 = vector.broadcast %57 : vector<1x32xf32> to vector<24x32xf32>
      %59 = vector.shape_cast %56 : vector<1x32xf32> to vector<1x32xf32>
      %60 = vector.broadcast %59 : vector<1x32xf32> to vector<24x32xf32>
      %61 = arith.select %54, %58, %60 : vector<24x32xi1>, vector<24x32xf32>
      %62 = arith.addf %51, %61 : vector<24x32xf32>
      %63 = vector.extract_strided_slice %62 {offsets = [0, 0], sizes = [8, 32], strides = [1, 1]} : vector<24x32xf32> to vector<8x32xf32>
      %c0_35 = arith.constant 0 : index
      %c0_36 = arith.constant 0 : index
      %64 = vector.load %arg18[%c0_35, %c0_36] : memref<8x32xf32, #tpu.memory_space<vmem>>, vector<8x32xf32>
      tpu.vector_store %arg18[%c0_35, %c0_36], %63 {strides = array<i32>} : memref<8x32xf32, #tpu.memory_space<vmem>>, vector<8x32xf32>,
      %65 = vector.extract_strided_slice %62 {offsets = [8, 0], sizes = [16, 32], strides = [1, 1]} : vector<24x32xf32> to vector<16x32xf32>
      %c0_37 = arith.constant 0 : index
      %c0_38 = arith.constant 0 : index
      %66 = vector.load %arg19[%c0_37, %c0_38] : memref<16x32xf32, #tpu.memory_space<vmem>>, vector<16x32xf32>
      tpu.vector_store %arg19[%c0_37, %c0_38], %65 {strides = array<i32>} : memref<16x32xf32, #tpu.memory_space<vmem>>, vector<16x32xf32>,
      %c0_39 = arith.constant 0 : index
      %c0_40 = arith.constant 0 : index
      %67 = vector.load %arg9[%c0_39, %c0_40] : memref<16x32xf32, #tpu.memory_space<vmem>>, vector<16x32xf32>
      %cst_41 = arith.constant dense<0.000000e+00> : vector<24x32xf32>
      %68 = tpu.matmul %12, %67, %cst_41 {dimension_numbers = #tpu.dot_dimension_numbers<[1], [0], [0], [1], [0, 0, 1, 1], [], []>} : vector<24x16xf32>, vector<16x32xf32>, vector<24x32xf32> -> vector<24x32xf32>
      %c0_42 = arith.constant 0 : index
      %c0_43 = arith.constant 0 : index
      %69 = vector.load %arg10[%c0_42, %c0_43] : memref<3x32xf32, #tpu.memory_space<vmem>>, vector<3x32xf32>
      %70 = vector.extract_strided_slice %69 {offsets = [0, 0], sizes = [1, 32], strides = [1, 1]} : vector<3x32xf32> to vector<1x32xf32>
      %71 = vector.broadcast %70 : vector<1x32xf32> to vector<24x32xf32>
      %72 = arith.mulf %68, %71 : vector<24x32xf32>
      %cst_44 = arith.constant dense<0.000000e+00> : vector<24xf32>
      %73 = vector.multi_reduction <add>, %72, %cst_44 [1] : vector<24x32xf32> to vector<24xf32>
      %74 = vector.shape_cast %73 : vector<24xf32> to vector<24x1xf32>
      %75 = vector.extract_strided_slice %69 {offsets = [1, 0], sizes = [1, 32], strides = [1, 1]} : vector<3x32xf32> to vector<1x32xf32>
      %76 = vector.broadcast %75 : vector<1x32xf32> to vector<24x32xf32>
      %77 = arith.mulf %68, %76 : vector<24x32xf32>
      %cst_45 = arith.constant dense<0.000000e+00> : vector<24xf32>
      %78 = vector.multi_reduction <add>, %77, %cst_45 [1] : vector<24x32xf32> to vector<24xf32>
      %79 = vector.shape_cast %78 : vector<24xf32> to vector<24x1xf32>
      %80 = tpu.iota {dimensions = array<i32: 0>} : vector<24x24xi32>
      %81 = tpu.iota {dimensions = array<i32: 1>} : vector<24x24xi32>
      %82 = arith.cmpi eq, %80, %81 : vector<24x24xi32>
      %83 = arith.extui %82 : vector<24x24xi1> to vector<24x24xi32>
      %84 = arith.sitofp %83 : vector<24x24xi32> to vector<24x24xf32>
      %cst_46 = arith.constant 1.000000e+00 : f32
      %85 = vector.broadcast %cst_46 : f32 to vector<24x24xf32>
      %86 = vector.broadcast %79 : vector<24x1xf32> to vector<24x24xf32>
      %87 = arith.mulf %86, %84 : vector<24x24xf32>
      %cst_47 = arith.constant dense<0.000000e+00> : vector<24x24xf32>
      %88 = tpu.matmul %85, %87, %cst_47 {dimension_numbers = #tpu.dot_dimension_numbers<[1], [0], [0], [1], [0, 0, 1, 1], [], []>} : vector<24x24xf32>, vector<24x24xf32>, vector<24x24xf32> -> vector<24x24xf32>
      %89 = vector.broadcast %74 : vector<24x1xf32> to vector<24x24xf32>
      %90 = arith.addf %89, %88 : vector<24x24xf32>
      %cst_48 = arith.constant 0.000000e+00 : f32
      %91 = vector.broadcast %cst_48 : f32 to vector<24x24xf32>
      %92 = arith.cmpf ogt, %90, %91 : vector<24x24xf32>
      %cst_49 = arith.constant 2.000000e-01 : f32
      %93 = vector.broadcast %cst_49 : f32 to vector<24x24xf32>
      %94 = arith.mulf %93, %90 : vector<24x24xf32>
      %95 = arith.select %92, %90, %94 : vector<24x24xi1>, vector<24x24xf32>
      %c0_50 = arith.constant 0 : index
      %c0_51 = arith.constant 0 : index
      %96 = vector.load %arg2[%c0_50, %c0_51] : memref<24x24xf32, #tpu.memory_space<vmem>>, vector<24x24xf32>
      %cst_52 = arith.constant 0.000000e+00 : f32
      %97 = vector.broadcast %cst_52 : f32 to vector<24x24xf32>
      %98 = arith.cmpf ogt, %96, %97 : vector<24x24xf32>
      %cst_53 = arith.constant -1.000000e+30 : f32
      %99 = vector.broadcast %cst_53 : f32 to vector<24x24xf32>
      %100 = arith.select %98, %95, %99 : vector<24x24xi1>, vector<24x24xf32>
      %cst_54 = arith.constant dense<0xFF800000> : vector<24xf32>
      %101 = vector.multi_reduction <maximumf>, %100, %cst_54 [1] : vector<24x24xf32> to vector<24xf32>
      %102 = vector.shape_cast %101 : vector<24xf32> to vector<24x1xf32>
      %103 = vector.broadcast %102 : vector<24x1xf32> to vector<24x24xf32>
      %104 = arith.subf %100, %103 : vector<24x24xf32>
      %105 = math.exp %104 : vector<24x24xf32>
      %106 = arith.mulf %105, %96 : vector<24x24xf32>
      %cst_55 = arith.constant dense<0.000000e+00> : vector<24xf32>
      %107 = vector.multi_reduction <add>, %106, %cst_55 [1] : vector<24x24xf32> to vector<24xf32>
      %108 = vector.shape_cast %107 : vector<24xf32> to vector<24x1xf32>
      %109 = vector.broadcast %108 : vector<24x1xf32> to vector<24x24xf32>
      %110 = arith.divf %106, %109 : vector<24x24xf32>
      %cst_56 = arith.constant dense<0.000000e+00> : vector<24x32xf32>
      %111 = tpu.matmul %110, %68, %cst_56 {dimension_numbers = #tpu.dot_dimension_numbers<[1], [0], [0], [1], [0, 0, 1, 1], [], []>} : vector<24x24xf32>, vector<24x32xf32>, vector<24x32xf32> -> vector<24x32xf32>
      %112 = vector.extract_strided_slice %69 {offsets = [2, 0], sizes = [1, 32], strides = [1, 1]} : vector<3x32xf32> to vector<1x32xf32>
      %113 = vector.broadcast %112 : vector<1x32xf32> to vector<24x32xf32>
      %114 = arith.addf %111, %113 : vector<24x32xf32>
      %115 = vector.extract_strided_slice %62 {offsets = [0, 0], sizes = [8, 32], strides = [1, 1]} : vector<24x32xf32> to vector<8x32xf32>
      %cst_57 = arith.constant dense<0.000000e+00> : vector<32xf32>
      %116 = vector.multi_reduction <add>, %115, %cst_57 [0] : vector<8x32xf32> to vector<32xf32>
      %117 = vector.shape_cast %116 : vector<32xf32> to vector<1x32xf32>
      %118 = vector.extract_strided_slice %62 {offsets = [8, 0], sizes = [16, 32], strides = [1, 1]} : vector<24x32xf32> to vector<16x32xf32>
      %cst_58 = arith.constant dense<0.000000e+00> : vector<32xf32>
      %119 = vector.multi_reduction <add>, %118, %cst_58 [0] : vector<16x32xf32> to vector<32xf32>
      %120 = vector.shape_cast %119 : vector<32xf32> to vector<1x32xf32>
      %121 = vector.extract_strided_slice %114 {offsets = [0, 0], sizes = [8, 32], strides = [1, 1]} : vector<24x32xf32> to vector<8x32xf32>
      %cst_59 = arith.constant dense<0.000000e+00> : vector<32xf32>
      %122 = vector.multi_reduction <add>, %121, %cst_59 [0] : vector<8x32xf32> to vector<32xf32>
      %123 = vector.shape_cast %122 : vector<32xf32> to vector<1x32xf32>
      %124 = vector.extract_strided_slice %114 {offsets = [8, 0], sizes = [16, 32], strides = [1, 1]} : vector<24x32xf32> to vector<16x32xf32>
      %cst_60 = arith.constant dense<0.000000e+00> : vector<32xf32>
      %125 = vector.multi_reduction <add>, %124, %cst_60 [0] : vector<16x32xf32> to vector<32xf32>
      %126 = vector.shape_cast %125 : vector<32xf32> to vector<1x32xf32>
      %c0_61 = arith.constant 0 : index
      %c0_62 = arith.constant 0 : index
      %127 = vector.load %arg11[%c0_61, %c0_62] : memref<128x64xf32, #tpu.memory_space<vmem>>, vector<128x64xf32>
      %c0_63 = arith.constant 0 : index
      %c0_64 = arith.constant 0 : index
      %128 = vector.load %arg12[%c0_63, %c0_64] : memref<3x64xf32, #tpu.memory_space<vmem>>, vector<3x64xf32>
      %129 = vector.extract_strided_slice %127 {offsets = [0, 0], sizes = [32, 64], strides = [1, 1]} : vector<128x64xf32> to vector<32x64xf32>
      %cst_65 = arith.constant dense<0.000000e+00> : vector<1x64xf32>
      %130 = tpu.matmul %117, %129, %cst_65 {dimension_numbers = #tpu.dot_dimension_numbers<[1], [0], [0], [1], [0, 0, 1, 1], [], []>} : vector<1x32xf32>, vector<32x64xf32>, vector<1x64xf32> -> vector<1x64xf32>
      %131 = vector.extract_strided_slice %127 {offsets = [32, 0], sizes = [32, 64], strides = [1, 1]} : vector<128x64xf32> to vector<32x64xf32>
      %cst_66 = arith.constant dense<0.000000e+00> : vector<1x64xf32>
      %132 = tpu.matmul %123, %131, %cst_66 {dimension_numbers = #tpu.dot_dimension_numbers<[1], [0], [0], [1], [0, 0, 1, 1], [], []>} : vector<1x32xf32>, vector<32x64xf32>, vector<1x64xf32> -> vector<1x64xf32>
      %133 = arith.addf %130, %132 : vector<1x64xf32>
      %134 = vector.extract_strided_slice %127 {offsets = [64, 0], sizes = [32, 64], strides = [1, 1]} : vector<128x64xf32> to vector<32x64xf32>
      %cst_67 = arith.constant dense<0.000000e+00> : vector<1x64xf32>
      %135 = tpu.matmul %120, %134, %cst_67 {dimension_numbers = #tpu.dot_dimension_numbers<[1], [0], [0], [1], [0, 0, 1, 1], [], []>} : vector<1x32xf32>, vector<32x64xf32>, vector<1x64xf32> -> vector<1x64xf32>
      %136 = arith.addf %133, %135 : vector<1x64xf32>
      %137 = vector.extract_strided_slice %127 {offsets = [96, 0], sizes = [32, 64], strides = [1, 1]} : vector<128x64xf32> to vector<32x64xf32>
      %cst_68 = arith.constant dense<0.000000e+00> : vector<1x64xf32>
      %138 = tpu.matmul %126, %137, %cst_68 {dimension_numbers = #tpu.dot_dimension_numbers<[1], [0], [0], [1], [0, 0, 1, 1], [], []>} : vector<1x32xf32>, vector<32x64xf32>, vector<1x64xf32> -> vector<1x64xf32>
      %139 = arith.addf %136, %138 : vector<1x64xf32>
      %140 = vector.extract_strided_slice %128 {offsets = [0, 0], sizes = [1, 64], strides = [1, 1]} : vector<3x64xf32> to vector<1x64xf32>
      %141 = arith.addf %139, %140 : vector<1x64xf32>
      %c0_69 = arith.constant 0 : index
      %c0_70 = arith.constant 0 : index
      %142 = vector.load %arg13[%c0_69, %c0_70] : memref<64x32xf32, #tpu.memory_space<vmem>>, vector<64x32xf32>
      %cst_71 = arith.constant dense<0.000000e+00> : vector<1x32xf32>
      %143 = tpu.matmul %141, %142, %cst_71 {dimension_numbers = #tpu.dot_dimension_numbers<[1], [0], [0], [1], [0, 0, 1, 1], [], []>} : vector<1x64xf32>, vector<64x32xf32>, vector<1x32xf32> -> vector<1x32xf32>
      %144 = vector.extract_strided_slice %128 {offsets = [1, 0], sizes = [1, 32], strides = [1, 1]} : vector<3x64xf32> to vector<1x32xf32>
      %145 = arith.addf %143, %144 : vector<1x32xf32>
      %cst_72 = arith.constant 0.000000e+00 : f32
      %146 = vector.broadcast %cst_72 : f32 to vector<1x32xf32>
      %147 = arith.maximumf %145, %146 : vector<1x32xf32>
      %c0_73 = arith.constant 0 : index
      %c0_74 = arith.constant 0 : index
      %148 = vector.load %arg14[%c0_73, %c0_74] : memref<32x16xf32, #tpu.memory_space<vmem>>, vector<32x16xf32>
      %cst_75 = arith.constant dense<0.000000e+00> : vector<1x16xf32>
      %149 = tpu.matmul %147, %148, %cst_75 {dimension_numbers = #tpu.dot_dimension_numbers<[1], [0], [0], [1], [0, 0, 1, 1], [], []>} : vector<1x32xf32>, vector<32x16xf32>, vector<1x16xf32> -> vector<1x16xf32>
      %150 = vector.extract_strided_slice %128 {offsets = [2, 0], sizes = [1, 16], strides = [1, 1]} : vector<3x64xf32> to vector<1x16xf32>
      %151 = arith.addf %149, %150 : vector<1x16xf32>
      %cst_76 = arith.constant 0.000000e+00 : f32
      %152 = vector.broadcast %cst_76 : f32 to vector<1x16xf32>
      %153 = arith.maximumf %151, %152 : vector<1x16xf32>
      %c0_77 = arith.constant 0 : index
      %c0_78 = arith.constant 0 : index
      %154 = vector.load %arg20[%c0_77, %c0_78] : memref<1x16xf32, #tpu.memory_space<vmem>>, vector<1x16xf32>
      tpu.vector_store %arg20[%c0_77, %c0_78], %153 {strides = array<i32>} : memref<1x16xf32, #tpu.memory_space<vmem>>, vector<1x16xf32>,
    } else {
    }
    %c0 = arith.constant 0 : index
    %c0_1 = arith.constant 0 : index
    %3 = vector.load %arg20[%c0, %c0_1] : memref<1x16xf32, #tpu.memory_space<vmem>>, vector<1x16xf32>
    %4 = arith.truncf %3 : vector<1x16xf32> to vector<1x16xbf16>
    %c0_2 = arith.constant 0 : index
    %c0_3 = arith.constant 0 : index
    %5 = vector.load %arg15[%c0_2, %c0_3] : memref<16x4736xbf16, #tpu.memory_space<vmem>>, vector<16x4736xbf16>
    %cst = arith.constant dense<0.000000e+00> : vector<1x4736xf32>
    %6 = tpu.matmul %4, %5, %cst {dimension_numbers = #tpu.dot_dimension_numbers<[1], [0], [0], [1], [0, 0, 1, 1], [], []>} : vector<1x16xbf16>, vector<16x4736xbf16>, vector<1x4736xf32> -> vector<1x4736xf32>
    %c0_4 = arith.constant 0 : index
    %c0_5 = arith.constant 0 : index
    %7 = vector.load %arg16[%c0_4, %c0_5] : memref<1x4736xf32, #tpu.memory_space<vmem>>, vector<1x4736xf32>
    %8 = arith.addf %6, %7 : vector<1x4736xf32>
    %cst_6 = arith.constant 0.000000e+00 : f32
    %9 = vector.broadcast %cst_6 : f32 to vector<1x4736xf32>
    %10 = arith.maximumf %8, %9 : vector<1x4736xf32>
    %c0_7 = arith.constant 0 : index
    %c0_8 = arith.constant 0 : index
    %11 = vector.load %arg17[%c0_7, %c0_8] : memref<1x4736xf32, #tpu.memory_space<vmem>>, vector<1x4736xf32>
    tpu.vector_store %arg17[%c0_7, %c0_8], %10 {strides = array<i32>} : memref<1x4736xf32, #tpu.memory_space<vmem>>, vector<1x4736xf32>,
    return
  }
  func.func @transform_0(%arg0: i32) -> (i32, i32) {
    %c0_i32 = arith.constant 0 : i32
    %c0_i32_0 = arith.constant 0 : i32
    %c0_i32_1 = arith.constant 0 : i32
    return %c0_i32, %c0_i32_0 : i32, i32
  }
  func.func @transform_1(%arg0: i32) -> (i32, i32) {
    %c0_i32 = arith.constant 0 : i32
    %c0_i32_0 = arith.constant 0 : i32
    %c0_i32_1 = arith.constant 0 : i32
    return %c0_i32, %c0_i32_0 : i32, i32
  }
  func.func @transform_2(%arg0: i32) -> (i32, i32) {
    %c0_i32 = arith.constant 0 : i32
    %c0_i32_0 = arith.constant 0 : i32
    %c0_i32_1 = arith.constant 0 : i32
    return %c0_i32, %c0_i32_0 : i32, i32
  }
  func.func @transform_3(%arg0: i32) -> (i32, i32) {
    %c0_i32 = arith.constant 0 : i32
    %c0_i32_0 = arith.constant 0 : i32
    %c0_i32_1 = arith.constant 0 : i32
    return %c0_i32, %c0_i32_0 : i32, i32
  }
  func.func @transform_4(%arg0: i32) -> (i32, i32) {
    %c0_i32 = arith.constant 0 : i32
    %c0_i32_0 = arith.constant 0 : i32
    %c0_i32_1 = arith.constant 0 : i32
    return %c0_i32, %c0_i32_0 : i32, i32
  }
  func.func @transform_5(%arg0: i32) -> (i32, i32) {
    %c0_i32 = arith.constant 0 : i32
    %c0_i32_0 = arith.constant 0 : i32
    %c0_i32_1 = arith.constant 0 : i32
    return %c0_i32, %c0_i32_0 : i32, i32
  }
  func.func @transform_6(%arg0: i32) -> (i32, i32) {
    %c0_i32 = arith.constant 0 : i32
    %c0_i32_0 = arith.constant 0 : i32
    %c0_i32_1 = arith.constant 0 : i32
    return %c0_i32, %c0_i32_0 : i32, i32
  }
  func.func @transform_7(%arg0: i32) -> (i32, i32) {
    %c0_i32 = arith.constant 0 : i32
    %c0_i32_0 = arith.constant 0 : i32
    %c0_i32_1 = arith.constant 0 : i32
    return %c0_i32, %c0_i32_0 : i32, i32
  }
  func.func @transform_8(%arg0: i32) -> (i32, i32) {
    %c0_i32 = arith.constant 0 : i32
    %c0_i32_0 = arith.constant 0 : i32
    %c0_i32_1 = arith.constant 0 : i32
    return %c0_i32, %c0_i32_0 : i32, i32
  }
  func.func @transform_9(%arg0: i32) -> (i32, i32) {
    %c0_i32 = arith.constant 0 : i32
    %c0_i32_0 = arith.constant 0 : i32
    %c0_i32_1 = arith.constant 0 : i32
    return %c0_i32, %c0_i32_0 : i32, i32
  }
  func.func @transform_10(%arg0: i32) -> (i32, i32) {
    %c0_i32 = arith.constant 0 : i32
    %c0_i32_0 = arith.constant 0 : i32
    %c0_i32_1 = arith.constant 0 : i32
    return %c0_i32, %c0_i32_0 : i32, i32
  }
  func.func @transform_11(%arg0: i32) -> (i32, i32) {
    %c0_i32 = arith.constant 0 : i32
    %c0_i32_0 = arith.constant 0 : i32
    %c0_i32_1 = arith.constant 0 : i32
    return %c0_i32, %c0_i32_0 : i32, i32
  }
  func.func @transform_12(%arg0: i32) -> (i32, i32) {
    %c0_i32 = arith.constant 0 : i32
    %c0_i32_0 = arith.constant 0 : i32
    %c0_i32_1 = arith.constant 0 : i32
    return %c0_i32, %c0_i32_0 : i32, i32
  }
  func.func @transform_13(%arg0: i32) -> (i32, i32) {
    %c0_i32 = arith.constant 0 : i32
    %c0_i32_0 = arith.constant 0 : i32
    %c0_i32_1 = arith.constant 0 : i32
    return %c0_i32, %c0_i32_0 : i32, i32
  }
  func.func @transform_14(%arg0: i32) -> (i32, i32) {
    %c0_i32 = arith.constant 0 : i32
    %c0_i32_0 = arith.constant 0 : i32
    return %c0_i32, %arg0 : i32, i32
  }
  func.func @transform_15(%arg0: i32) -> (i32, i32) {
    %c0_i32 = arith.constant 0 : i32
    %c0_i32_0 = arith.constant 0 : i32
    return %c0_i32, %arg0 : i32, i32
  }
  func.func @transform_16(%arg0: i32) -> (i32, i32) {
    %c0_i32 = arith.constant 0 : i32
    %c0_i32_0 = arith.constant 0 : i32
    return %c0_i32, %arg0 : i32, i32
  }
  func.func @transform_17(%arg0: i32) -> (i32, i32) {
    %c0_i32 = arith.constant 0 : i32
    %c0_i32_0 = arith.constant 0 : i32
    %c0_i32_1 = arith.constant 0 : i32
    return %c0_i32, %c0_i32_0 : i32, i32
  }
  func.func @transform_18(%arg0: i32) -> (i32, i32) {
    %c0_i32 = arith.constant 0 : i32
    %c0_i32_0 = arith.constant 0 : i32
    %c0_i32_1 = arith.constant 0 : i32
    return %c0_i32, %c0_i32_0 : i32, i32
  }
}

</mosaic_0001>

<bundles_post_ra>
// kernel: tpu_custom_call.1
= control target key start
LH: loop header
LB: loop body
LE: loop exit
PB: predicated region body
PF: predicated region fallthrough
CT: control target
= control target key end

     0   :  { %s6447_s0 = inlined_call_operand.hbm [shape: f32[24,24], index: 0, kind: input, shape index: {}]   ;;  %s6448_s1 = inlined_call_operand.hbm [shape: f32[24,24], index: 1, kind: input, shape index: {}]   ;;  %s6449_s2 = inlined_call_operand.vmem [shape: f32[24,16], index: 2, kind: input, shape index: {}]   ;;  %s6450_s3 = inlined_call_operand.hbm [shape: f32[16,64], index: 3, kind: input, shape index: {}]   ;;  %s6451_s4 = inlined_call_operand.hbm [shape: f32[64,64], index: 4, kind: input, shape index: {}]   ;;  %s6452_s5 = inlined_call_operand.hbm [shape: f32[64,64], index: 5, kind: input, shape index: {}]   ;;  %s6453_s6 = inlined_call_operand.vmem [shape: f32[64,32], index: 6, kind: input, shape index: {}]   ;;  %s6454_s7 = inlined_call_operand.hbm [shape: f32[5,64], index: 7, kind: input, shape index: {}]   ;;  %s6455_s8 = inlined_call_operand.hbm [shape: f32[16,32], index: 8, kind: input, shape index: {}]   ;;  %s6456_s9 = inlined_call_operand.hbm [shape: f32[3,32], index: 9, kind: input, shape index: {}]   ;;  %s6457_s10 = inlined_call_operand.vmem [shape: f32[128,64], index: 10, kind: input, shape index: {}]   ;;  %s6458_s11 = inlined_call_operand.hbm [shape: f32[3,64], index: 11, kind: input, shape index: {}]   ;;  %s6459_s12 = inlined_call_operand.vmem [shape: f32[64,32], index: 12, kind: input, shape index: {}]   ;;  %s6460_s13 = inlined_call_operand.vmem [shape: f32[32,16], index: 13, kind: input, shape index: {}]   ;;  %s6461_s14 = inlined_call_operand.hbm [shape: bf16[16,37888], index: 14, kind: input, shape index: {}]   ;;  %s6462_s15 = inlined_call_operand.hbm [shape: f32[1,37888], index: 15, kind: input, shape index: {}]   ;;  %s6463_s16 = inlined_call_operand.hbm [shape: f32[1,37888], index: 16, kind: output, shape index: {0}]   ;;  %s6464_s17 = inlined_call_operand.hbm [shape: f32[8,32], index: 17, kind: output, shape index: {1}]   ;;  %s6465_s18 = inlined_call_operand.hbm [shape: f32[16,32], index: 18, kind: output, shape index: {2}]  }
   0x1   :  { %6499 = sst [smem:[#allocation39_spill]] %s6447_s0 }
   0x2   :  { %6500 = sst [smem:[#allocation40_spill]] %s6448_s1 }
   0x3   :  { %6501 = sst [smem:[#allocation41_spill]] %s6449_s2 }
   0x4   :  { %6502 = sst [smem:[#allocation42_spill]] %s6451_s4 }
   0x5   :  { %6503 = sst [smem:[#allocation43_spill]] %s6453_s6 }
   0x6   :  { %6504 = sst [smem:[#allocation44_spill]] %s6454_s7 }
   0x7   :  { %6505 = sst [smem:[#allocation45_spill]] %s6456_s9 }
   0x8   :  { %6506 = sst [smem:[#allocation46_spill]] %s6457_s10 }
   0x9   :  { %6507 = sst [smem:[#allocation47_spill]] %s6459_s12 }
   0xa   :  { %6508 = sst [smem:[#allocation48_spill]] %s6460_s13 }
   0xb   :  { %6509 = sst [smem:[#allocation49_spill]] %s6461_s14 }
   0xc   :  { %6510 = sst [smem:[#allocation50_spill]] %s6463_s16 }
   0xd   :  { %6511 = sst [smem:[#allocation51_spill]] %s6464_s17 }
   0xe   :  { %6512 = sst [smem:[#allocation52_spill]] %s6465_s18 }
   0xf   :  { %24 = vsyncpa [#allocation4], 0 }
  0x10   :  { %25 = vsyncpa [#allocation7], 0 }
  0x11   :  { %26 = vsyncpa [#allocation10], 0 }
  0x12   :  { %27 = vsyncpa [#allocation13], 0 }
  0x13   :  { %28 = vsyncpa [#allocation16], 0 }
  0x14   :  { %29 = vsyncpa [#allocation19], 0 }
  0x15   :  { %31 = vsyncpa [#allocation19 + $0x1], 0 }
  0x16   :  { %32 = vsyncpa [#allocation5], 0 }
  0x17   :  { %34 = vsyncpa [#allocation5 + $0x1], 0 }
  0x18   :  { %35 = vsyncpa [#allocation23], 0  ;;  %s5415_s27 = smov 0   ;;  %s5417_s28 = smov 0  }
  0x19   :  { %s5419_s29 = smov 0   ;;  %s5421_s30 = smov 0  }
  0x1a LB: > { %6513 = sst [smem:[#allocation33_spill]] %s5276_s27  ;;  %s5436_s0 = sadd.s32 4294967295, %s5288_s30   ;;  %s5288_s30 = sphi %s5421_s30, %s6576_s30   ;;  %s5284_s29 = sphi %s5419_s29, %s6580_s29   ;;  %s5280_s28 = sphi %s5417_s28, %s6579_s28   ;;  %s5276_s27 = sphi %s5415_s27, %s6578_s27  }
  0x1b   : > { %p4025_p0 = scmp.ge.s32.totalorder %s5288_s30, 1  ;;  %p6477_p1 = scmp.eq.s32.totalorder %s5436_s0, 0 }
  0x1c   : > { %p460_p2 = scmp.lt.s32.totalorder %s5288_s30, 9  ;;  %s5290_s1 = smov [#allocation6]  }
  0x1d   : > { %s485_s20 = sshll.u32 %s5290_s1, 4  ;;  %s5291_s21 = smov [#allocation9]   ;;  %s5446_s20 = int_to_ptr.vmem [resolvable:$true] %s485_s20 }
  0x1e   : > { %p5442_p4 = pnand %p4025_p0, %p460_p2  ;;  %s514_s22 = sshll.u32 %s5291_s21, 4  ;;  %s5456_s22 = int_to_ptr.vmem [resolvable:$true] %s514_s22 }
  0x1f   : > { %s5292_s23 = smov [#allocation12]   ;;  %s6517_s1 = sld [smem:[#allocation40_spill]] }
  0x20   : > { %s6514_s19 = scalar_select %p5442_p4, 1, 0 }
  0x21   : > { %p4645_p5 = pneg %p5442_p4  ;;  %s544_s24 = sshll.u32 %s5292_s23, 4  ;;  %s5458_s24 = int_to_ptr.vmem [resolvable:$true] %s544_s24 }
  0x22   : > { %6515 = sst [smem:[#allocation34_spill]] %s6514_s19 }
  0x23   : > { %p5452_p6 = pnand %p4645_p5, %p6477_p1 }
  0x25   : > { %s6516_s2 = scalar_select %p5452_p6, 1, 0 }
  0x26   : > { %s4834_s16 = scalar_lea.hbm %s6517_s1, 384  ;;  %p5468_p8 = pneg %p5452_p6 }
  0x27   : > { %p4835_p7 = scmp.ne.s32.totalorder %s6517_s1, %s4834_s16  ;;  %p4841_p11 = scmp.lt.u32.totalorder %s4834_s16, %s6517_s1 }
  0x29   : > { %p4837_p9 = pnand %p5468_p8, %p4835_p7 }
  0x2b   : > { %p4838_p10 = pneg %p4837_p9 }
  0x2d   : > { %p4843_p12 = pnand %p4841_p11, %p4838_p10 }
  0x2f   : > { %4846 = shalt.err (!%p4843_p12)
}
  0x30   : > { %s4847_s17 = scalar_lea.vmem %s5446_s20, 384  ;;  %p4855_p5 = scmp.lt.s32.totalorder %s5446_s20, %s5446_s20 }
  0x31   : > { %p4848_p13 = scmp.ne.s32.totalorder %s5446_s20, %s4847_s17  ;;  %p4856_p3 = scmp.lt.s32.totalorder %s4847_s17, %s4847_s17 }
  0x33   : > { %p4850_p0 = pnand %p4848_p13, %p5468_p8  ;;  %p4857_p7 = por %p4856_p3, %p4855_p5 }
  0x35   : > { %p4851_p2 = pneg %p4850_p0 }
  0x37   : > { %p4858_p9 = pnand %p4857_p7, %p4851_p2 }
  0x39   : > { %4861 = shalt.err (!%p4858_p9)
}
  0x3a   : > { %s6479_s18 = smov 128   ;;  %s6481_s13 = smov 8  }
  0x3b   : > { %4651 = dma.hbm_to_vmem [thread:$0]  (!%p5452_p6), %s6517_s1, 384, %s5446_s20, [#allocation7], %s6479_s18, %s6479_s18, %s6481_s13  }
  0x3c   : > { %s6519_s4 = sld [smem:[#allocation42_spill]] }
  0x42   : > { %s4862_s17 = scalar_lea.hbm %s6519_s4, 1024 }
  0x43   : > { %p4863_p3 = scmp.ne.s32.totalorder %s6519_s4, %s4862_s17  ;;  %p4869_p12 = scmp.lt.u32.totalorder %s4862_s17, %s6519_s4 }
  0x45   : > { %p4865_p10 = pnand %p4863_p3, %p5468_p8 }
  0x47   : > { %p4866_p11 = pneg %p4865_p10 }
  0x49   : > { %p4871_p13 = pnand %p4869_p12, %p4866_p11 }
  0x4b   : > { %4874 = shalt.err (!%p4871_p13)
}
  0x4c   : > { %s4875_s20 = scalar_lea.vmem %s5456_s22, 1024  ;;  %p4883_p7 = scmp.lt.s32.totalorder %s5456_s22, %s5456_s22 }
  0x4d   : > { %p4876_p0 = scmp.ne.s32.totalorder %s5456_s22, %s4875_s20  ;;  %p4884_p9 = scmp.lt.s32.totalorder %s4875_s20, %s4875_s20 }
  0x4f   : > { %p4878_p2 = pnand %p4876_p0, %p5468_p8  ;;  %p4885_p3 = por %p4884_p9, %p4883_p7 }
  0x51   : > { %p4879_p5 = pneg %p4878_p2 }
  0x53   : > { %p4886_p10 = pnand %p4885_p3, %p4879_p5 }
  0x55   : > { %4889 = shalt.err (!%p4886_p10)
}
  0x56   : > { %4657 = dma.hbm_to_vmem [thread:$0]  (!%p5452_p6), %s6519_s4, 1024, %s5456_s22, [#allocation10], %s6479_s18, %s6479_s18, %s6481_s13  }
  0x57   : > { %s6520_s7 = sld [smem:[#allocation44_spill]] }
  0x5d   : > { %s4890_s16 = scalar_lea.hbm %s6520_s7, 128 }
  0x5e   : > { %p4891_p11 = scmp.ne.s32.totalorder %s6520_s7, %s4890_s16  ;;  %p4897_p0 = scmp.lt.u32.totalorder %s4890_s16, %s6520_s7 }
  0x60   : > { %p4893_p12 = pnand %p4891_p11, %p5468_p8 }
  0x62   : > { %p4894_p13 = pneg %p4893_p12 }
  0x64   : > { %p4899_p2 = pnand %p4897_p0, %p4894_p13 }
  0x66   : > { %4902 = shalt.err (!%p4899_p2)
}
  0x67   : > { %s4903_s22 = scalar_lea.vmem %s5458_s24, 128  ;;  %p4911_p3 = scmp.lt.s32.totalorder %s5458_s24, %s5458_s24 }
  0x68   : > { %p4904_p5 = scmp.ne.s32.totalorder %s5458_s24, %s4903_s22  ;;  %p4912_p10 = scmp.lt.s32.totalorder %s4903_s22, %s4903_s22 }
  0x6a   : > { %p4906_p7 = pnand %p4904_p5, %p5468_p8  ;;  %p4913_p11 = por %p4912_p10, %p4911_p3 }
  0x6c   : > { %p4907_p9 = pneg %p4906_p7 }
  0x6e   : > { %p4914_p12 = pnand %p4913_p11, %p4907_p9 }
  0x70   : > { %4917 = shalt.err (!%p4914_p12)
}
  0x71   : > { %4663 = dma.hbm_to_vmem [thread:$0]  (!%p5452_p6), %s6520_s7, 128, %s5458_s24, [#allocation13]  }
  0x72   : > { %s5295_s10 = smov [#allocation15]   ;;  %s6521_s9 = sld [smem:[#allocation45_spill]] }
  0x73   : > { %s568_s12 = sshll.u32 %s5295_s10, 4  ;;  %s569_s12 = int_to_ptr.vmem [resolvable:$true] %s568_s12 }
  0x78   : > { %s4918_s25 = scalar_lea.hbm %s6521_s9, 64 }
  0x79   : > { %p4919_p13 = scmp.ne.s32.totalorder %s6521_s9, %s4918_s25  ;;  %p4925_p5 = scmp.lt.u32.totalorder %s4918_s25, %s6521_s9 }
  0x7b   : > { %p4921_p0 = pnand %p4919_p13, %p5468_p8 }
  0x7d   : > { %p4922_p2 = pneg %p4921_p0 }
  0x7f   : > { %p4927_p7 = pnand %p4925_p5, %p4922_p2 }
  0x81   : > { %4930 = shalt.err (!%p4927_p7)
}
  0x82   : > { %s4931_s24 = scalar_lea.vmem %s569_s12, 64  ;;  %p4939_p11 = scmp.lt.s32.totalorder %s569_s12, %s569_s12 }
  0x83   : > { %p4932_p9 = scmp.ne.s32.totalorder %s569_s12, %s4931_s24  ;;  %p4940_p12 = scmp.lt.s32.totalorder %s4931_s24, %s4931_s24 }
  0x85   : > { %p4934_p3 = pnand %p4932_p9, %p5468_p8  ;;  %p4941_p1 = por %p4940_p12, %p4939_p11 }
  0x87   : > { %p4935_p10 = pneg %p4934_p3 }
  0x89   : > { %p4942_p4 = pnand %p4941_p1, %p4935_p10 }
  0x8b   : > { %4945 = shalt.err (!%p4942_p4)
}
  0x8c   : > { %4669 = dma.hbm_to_vmem [thread:$0]  (!%p5452_p6), %s6521_s9, 64, %s569_s12, [#allocation16]  }
  0x8d   : > { %s4024_s10 = sadd.s32 4294967294, %s5288_s30   ;;  %s5561_s19 = sadd.s32 1, %s5288_s30  }
  0x8e   : > { %6522 = sst [smem:[#allocation35_spill]] %s5561_s19  ;;  %s339_s16 = ssub.s32 %s5288_s30, %s5561_s19 }
  0x8f   : > { %s342_s25 = sadd.s32 1, %s5284_s29  ;;  %p340_p1 = scmp.eq.s32.totalorder %s339_s16, 0 }
  0x90   : > { %p349_p4 = scmp.ne.s32.totalorder %s5284_s29, %s5280_s28  ;;  %p350_p13 = scmp.eq.s32.totalorder %s5288_s30, 0 }
  0x91   : > { %p355_p0 = scmp.ne.s32.totalorder %s5280_s28, %s5276_s27  ;;  %p6524_p5 = scmp.eq.s32.totalorder %s5436_s0, 0 }
  0x92   : > { %s5572_s26 = scalar_select %p340_p1, %s5284_s29, %s342_s25  }
  0x93   : > { %p351_p2 = por %p350_p13, %p349_p4  ;;  %p5576_p7 = por %p6524_p5, %p355_p0 }
  0x94   : > { %6523 = sst [smem:[#allocation36_spill]] %s5572_s26  ;;  %p6485_p9 = scmp.eq.s32.totalorder %s5436_s0, 7 }
  0x95   : > { %s6525_s12 = scalar_select %p5576_p7, 1, 0 }
  0x96   : > { %p411_p3 = scmp.eq.s32.totalorder %s4024_s10, 7  ;;  %p4693_p10 = scmp.lt.s32.totalorder %s5288_s30, 8 }
  0x97   : > { %s599_s23 = sand.u32 1, %s5288_s30   ;;  %p5585_p11 = por %p6485_p9, %p349_p4 }
  0x98   : > { %p5589_p12 = por %p411_p3, %p355_p0  ;;  %s6484_s24 = sand.u32 1, %s5284_s29  }
  0x99   : > { %s6526_s17 = scalar_select %p5585_p11, 1, 0 }
  0x9a   : > { %s6528_s22 = scalar_select %p5589_p12, 1, 0 }
  0x9b   : > { %6527 = sst [smem:[#allocation37_spill]] %s6526_s17  ;;  %s4591_s20 = smul.u32 296, %s6484_s24 }
  0x9c   : > { %6529 = sst [smem:[#allocation38_spill]] %s6528_s22  ;;  %p5596_p1 = pnand %p4693_p10, %p351_p2 }
  0x9d   : > { %s4148_s10 = smul.u32 2368, %s5288_s30  ;;  %s6531_s14 = sld [smem:[#allocation49_spill]] }
  0x9e   : > { %s6530_s6 = scalar_select %p5596_p1, 1, 0 }
  0x9f   : > { %s603_s13 = scalar_lea.vmem [#allocation18], %s4591_s20  ;;  %s5608_s24 = scalar_lea.sflag [#allocation19], %s599_s23 }
  0xa0   : > { %s610_s1 = sshll.u32 %s603_s13, 4  ;;  %p6496_p13 = pneg %p5596_p1  ;;  %s5606_s1 = int_to_ptr.vmem [resolvable:$true] %s610_s1 }
  0xa3   : > { %s5604_s18 = scalar_lea.hbm %s6531_s14, %s4148_s10  ;;  %s4951_s25 = scalar_lea.hbm %s6531_s14, 37888 }
  0xa4   : > { %s4946_s4 = scalar_lea.hbm %s5604_s18, 4736  ;;  %p4952_p5 = scmp.lt.u32.totalorder %s5604_s18, %s6531_s14 }
  0xa5   : > { %p4947_p4 = scmp.ne.s32.totalorder %s5604_s18, %s4946_s4  ;;  %p4953_p3 = scmp.lt.u32.totalorder %s4951_s25, %s4946_s4 }
  0xa6   : > { %p4955_p9 = scmp.lt.u32.totalorder %s4946_s4, %s5604_s18 }
  0xa7   : > { %p4949_p0 = pnand %p6496_p13, %p4947_p4  ;;  %p4954_p10 = por %p4953_p3, %p4952_p5 }
  0xa9   : > { %p4950_p2 = pneg %p4949_p0  ;;  %p4956_p12 = por %p4955_p9, %p4954_p10 }
  0xab   : > { %p4957_p11 = pnand %p4956_p12, %p4950_p2 }
  0xad   : > { %4960 = shalt.err (!%p4957_p11)
}
  0xae   : > { %s4961_s13 = scalar_lea.vmem %s5606_s1, 4736  ;;  %s5296_s23 = smov [#allocation18]  }
  0xaf   : > { %p4962_p4 = scmp.ne.s32.totalorder %s5606_s1, %s4961_s13  ;;  %s4966_s20 = sshll.u32 %s5296_s23, 4  ;;  %s4967_s20 = int_to_ptr.vmem [resolvable:$false] %s4966_s20 }
  0xb0   : > { %s4968_s7 = scalar_lea.vmem %s4967_s20, 9472  ;;  %p4969_p6 = scmp.lt.s32.totalorder %s5606_s1, %s4967_s20 }
  0xb1   : > { %p4964_p0 = pnand %p4962_p4, %p6496_p13  ;;  %p4970_p5 = scmp.lt.s32.totalorder %s4968_s7, %s4961_s13 }
  0xb3   : > { %p4965_p7 = pneg %p4964_p0  ;;  %p4971_p3 = por %p4970_p5, %p4969_p6 }
  0xb5   : > { %p4972_p9 = pnand %p4971_p3, %p4965_p7 }
  0xb7   : > { %4975 = shalt.err (!%p4972_p9)
}
  0xb8   : > { %s5297_s4 = smov 18944   ;;  %s5298_s9 = smov 2368  }
  0xb9   : > { %s5299_s10 = smov 148   ;;  %s5300_s16 = smov [#allocation3]  }
  0xba   : > { %4676 = dma.hbm_to_vmem [thread:$0]  (!%p5596_p1), %s5604_s18, 4736, %s5606_s1, %s5608_s24, %s5297_s4, %s5298_s9, %s5299_s10  }
  0xbb   : > { %s472_s25 = sshll.u32 %s5300_s16, 4  ;;  %s5301_s23 = smov [#allocation8]   ;;  %s473_s25 = int_to_ptr.vmem [resolvable:$true] %s472_s25 }
  0xbc   : > { %s501_s14 = sshll.u32 %s5301_s23, 4  ;;  %s6532_s7 = sld [smem:[#allocation39_spill]]  ;;  %s502_s14 = int_to_ptr.vmem [resolvable:$true] %s501_s14 }
  0xc2   : > { %s4976_s26 = scalar_lea.hbm %s6532_s7, 384 }
  0xc3   : > { %p4977_p6 = scmp.ne.s32.totalorder %s6532_s7, %s4976_s26  ;;  %p4983_p12 = scmp.lt.u32.totalorder %s4976_s26, %s6532_s7 }
  0xc5   : > { %p4979_p7 = pnand %p4977_p6, %p5468_p8 }
  0xc7   : > { %p4980_p11 = pneg %p4979_p7 }
  0xc9   : > { %p4985_p2 = pnand %p4983_p12, %p4980_p11 }
  0xcb   : > { %4988 = shalt.err (!%p4985_p2)
}
  0xcc   : > { %s4989_s1 = scalar_lea.vmem %s473_s25, 384  ;;  %p4997_p5 = scmp.lt.s32.totalorder %s473_s25, %s473_s25 }
  0xcd   : > { %p4990_p10 = scmp.ne.s32.totalorder %s473_s25, %s4989_s1  ;;  %p4998_p3 = scmp.lt.s32.totalorder %s4989_s1, %s4989_s1 }
  0xcf   : > { %p4992_p4 = pnand %p4990_p10, %p5468_p8  ;;  %p4999_p9 = por %p4998_p3, %p4997_p5 }
  0xd1   : > { %p4993_p0 = pneg %p4992_p4 }
  0xd3   : > { %p5000_p13 = pnand %p4999_p9, %p4993_p0 }
  0xd5   : > { %5003 = shalt.err (!%p5000_p13)
}
  0xd6   : > { %p6533_p6 = scmp.ne.s32.totalorder %s6516_s2, 0  ;;  %s6534_s18 = smov 8  }
  0xd7   : > { %s6535_s19 = smov 128   ;;  %s5004_s4 = scalar_lea.hbm %s6450_s3, 256 }
  0xd8   : > { %4648 = dma.hbm_to_vmem [thread:$0]  (!%p6533_p6), %s6532_s7, 384, %s473_s25, [#allocation4], %s6535_s19, %s6535_s19, %s6534_s18  }
  0xd9   : > { %p5005_p7 = scmp.ne.s32.totalorder %s6450_s3, %s5004_s4  ;;  %p5011_p12 = scmp.lt.u32.totalorder %s5004_s4, %s6450_s3 }
  0xdb   : > { %p5007_p13 = pnand %p5005_p7, %p5468_p8 }
  0xdd   : > { %p5008_p11 = pneg %p5007_p13 }
  0xdf   : > { %p5013_p2 = pnand %p5011_p12, %p5008_p11 }
  0xe1   : > { %5016 = shalt.err (!%p5013_p2)
}
  0xe2   : > { %s5017_s20 = scalar_lea.vmem %s502_s14, 256  ;;  %p5025_p5 = scmp.lt.s32.totalorder %s502_s14, %s502_s14 }
  0xe3   : > { %p5018_p10 = scmp.ne.s32.totalorder %s502_s14, %s5017_s20  ;;  %p5026_p3 = scmp.lt.s32.totalorder %s5017_s20, %s5017_s20 }
  0xe5   : > { %p5020_p4 = pnand %p5018_p10, %p5468_p8  ;;  %p5027_p9 = por %p5026_p3, %p5025_p5 }
  0xe7   : > { %p5021_p0 = pneg %p5020_p4 }
  0xe9   : > { %p5028_p1 = pnand %p5027_p9, %p5021_p0 }
  0xeb   : > { %5031 = shalt.err (!%p5028_p1)
}
  0xec   : > { %4654 = dma.hbm_to_vmem [thread:$0]  (!%p6533_p6), %s6450_s3, 256, %s502_s14, [#allocation7], %s6535_s19, %s6535_s19, %s6534_s18  }
  0xed   : > { %s5302_s1 = smov [#allocation11]   ;;  %s5303_s26 = smov [#allocation14]  }
  0xee   : > { %s527_s27 = sshll.u32 %s5302_s1, 4  ;;  %s554_s17 = sshll.u32 %s5303_s26, 4  ;;  %s528_s27 = int_to_ptr.vmem [resolvable:$true] %s527_s27  ;;  %s555_s17 = int_to_ptr.vmem [resolvable:$true] %s554_s17 }
  0xef   : > { %s5032_s9 = scalar_lea.hbm %s6452_s5, 1024 }
  0xf0   : > { %p5033_p1 = scmp.ne.s32.totalorder %s6452_s5, %s5032_s9  ;;  %p5039_p11 = scmp.lt.u32.totalorder %s5032_s9, %s6452_s5 }
  0xf2   : > { %p5035_p7 = pnand %p5033_p1, %p5468_p8 }
  0xf4   : > { %p5036_p13 = pneg %p5035_p7 }
  0xf6   : > { %p5041_p12 = pnand %p5039_p11, %p5036_p13 }
  0xf8   : > { %5044 = shalt.err (!%p5041_p12)
}
  0xf9   : > { %s5045_s14 = scalar_lea.vmem %s528_s27, 1024  ;;  %p5053_p0 = scmp.lt.s32.totalorder %s528_s27, %s528_s27 }
  0xfa   : > { %p5046_p2 = scmp.ne.s32.totalorder %s528_s27, %s5045_s14  ;;  %p5054_p5 = scmp.lt.s32.totalorder %s5045_s14, %s5045_s14 }
  0xfc   : > { %p5048_p10 = pnand %p5046_p2, %p5468_p8  ;;  %p5055_p3 = por %p5054_p5, %p5053_p0 }
  0xfe   : > { %p5049_p4 = pneg %p5048_p10 }
 0x100   : > { %p5056_p9 = pnand %p5055_p3, %p5049_p4 }
 0x102   : > { %5059 = shalt.err (!%p5056_p9)
}
 0x103   : > { %4660 = dma.hbm_to_vmem [thread:$0]  (!%p6533_p6), %s6452_s5, 1024, %s528_s27, [#allocation10], %s6535_s19, %s6535_s19, %s6534_s18  }
 0x104   : > { %s5060_s22 = scalar_lea.hbm %s6455_s8, 256 }
 0x105   : > { %p5061_p1 = scmp.ne.s32.totalorder %s6455_s8, %s5060_s22  ;;  %p5067_p11 = scmp.lt.u32.totalorder %s5060_s22, %s6455_s8 }
 0x107   : > { %p5063_p7 = pnand %p5061_p1, %p5468_p8 }
 0x109   : > { %p5064_p13 = pneg %p5063_p7 }
 0x10b   : > { %p5069_p12 = pnand %p5067_p11, %p5064_p13 }
 0x10d   : > { %5072 = shalt.err (!%p5069_p12)
}
 0x10e   : > { %s5073_s23 = scalar_lea.vmem %s555_s17, 256  ;;  %p5081_p0 = scmp.lt.s32.totalorder %s555_s17, %s555_s17 }
 0x10f   : > { %p5074_p2 = scmp.ne.s32.totalorder %s555_s17, %s5073_s23  ;;  %p5082_p5 = scmp.lt.s32.totalorder %s5073_s23, %s5073_s23 }
 0x111   : > { %p5076_p10 = pnand %p5074_p2, %p5468_p8  ;;  %p5083_p3 = por %p5082_p5, %p5081_p0 }
 0x113   : > { %p5077_p4 = pneg %p5076_p10 }
 0x115   : > { %p5084_p9 = pnand %p5083_p3, %p5077_p4 }
 0x117   : > { %5087 = shalt.err (!%p5084_p9)
}
 0x118   : > { %4666 = dma.hbm_to_vmem [thread:$0]  (!%p6533_p6), %s6455_s8, 256, %s555_s17, [#allocation13], %s6535_s19, %s6535_s19, %s6534_s18  }
 0x119   : > { %s5304_s14 = smov [#allocation17]   ;;  %s6536_s13 = sand.u32 1, %s5284_s29  }
 0x11a   : > { %s582_s25 = sshll.u32 %s5304_s14, 4  ;;  %s4592_s1 = smul.u32 37, %s6536_s13  ;;  %s583_s25 = int_to_ptr.vmem [resolvable:$true] %s582_s25 }
 0x11b   : > { %s4149_s26 = smul.u32 592, %s5288_s30  ;;  %s5088_s9 = scalar_lea.hbm %s6458_s11, 64 }
 0x11c   : > { %p5089_p1 = scmp.ne.s32.totalorder %s6458_s11, %s5088_s9  ;;  %p5095_p11 = scmp.lt.u32.totalorder %s5088_s9, %s6458_s11 }
 0x11e   : > { %p5091_p7 = pnand %p5089_p1, %p5468_p8 }
 0x120   : > { %p5092_p13 = pneg %p5091_p7 }
 0x122   : > { %p5097_p12 = pnand %p5095_p11, %p5092_p13 }
 0x124   : > { %5100 = shalt.err (!%p5097_p12)
}
 0x125   : > { %s5101_s18 = scalar_lea.vmem %s583_s25, 64  ;;  %p5109_p0 = scmp.lt.s32.totalorder %s583_s25, %s583_s25 }
 0x126   : > { %p5102_p2 = scmp.ne.s32.totalorder %s583_s25, %s5101_s18  ;;  %p5110_p5 = scmp.lt.s32.totalorder %s5101_s18, %s5101_s18 }
 0x128   : > { %p5104_p10 = pnand %p5102_p2, %p5468_p8  ;;  %p5111_p3 = por %p5110_p5, %p5109_p0 }
 0x12a   : > { %p5105_p4 = pneg %p5104_p10 }
 0x12c   : > { %p5112_p9 = pnand %p5111_p3, %p5105_p4 }
 0x12e   : > { %5115 = shalt.err (!%p5112_p9)
}
 0x12f   : > { %4672 = dma.hbm_to_vmem [thread:$0]  (!%p6533_p6), %s6458_s11, 64, %s583_s25, [#allocation16]  }
 0x130   : > { %s5744_s13 = scalar_lea.hbm %s6462_s15, %s4149_s26  ;;  %s624_s21 = scalar_lea.vmem [#allocation20], %s4592_s1 }
 0x131   : > { %s632_s22 = sshll.u32 %s624_s21, 4  ;;  %s5116_s4 = scalar_lea.hbm %s5744_s13, 592  ;;  %s633_s22 = int_to_ptr.vmem [resolvable:$true] %s632_s22 }
 0x132   : > { %p5117_p8 = scmp.ne.s32.totalorder %s5744_s13, %s5116_s4  ;;  %p6537_p1 = scmp.ne.s32.totalorder %s6530_s6, 0 }
 0x133   : > { %s5121_s9 = scalar_lea.hbm %s6462_s15, 4736  ;;  %p5122_p6 = scmp.lt.u32.totalorder %s5744_s13, %s6462_s15 }
 0x134   : > { %p6538_p7 = pneg %p6537_p1  ;;  %p5123_p12 = scmp.lt.u32.totalorder %s5121_s9, %s5116_s4 }
 0x135   : > { %p5125_p10 = scmp.lt.u32.totalorder %s5116_s4, %s5744_s13 }
 0x136   : > { %p5119_p13 = pnand %p5117_p8, %p6538_p7  ;;  %p5124_p2 = por %p5123_p12, %p5122_p6 }
 0x138   : > { %p5120_p11 = pneg %p5119_p13  ;;  %p5126_p4 = por %p5125_p10, %p5124_p2 }
 0x13a   : > { %p5127_p0 = pnand %p5126_p4, %p5120_p11 }
 0x13c   : > { %5130 = shalt.err (!%p5127_p0)
}
 0x13d   : > { %s5131_s1 = scalar_lea.vmem %s633_s22, 592  ;;  %p6539_p3 = pmov %p6538_p7 }
 0x13e   : > { %p5132_p5 = scmp.ne.s32.totalorder %s633_s22, %s5131_s1  ;;  %s5305_s16 = smov [#allocation20]  }
 0x13f   : > { %s5136_s23 = sshll.u32 %s5305_s16, 4  ;;  %s5137_s23 = int_to_ptr.vmem [resolvable:$false] %s5136_s23 }
 0x140   : > { %p5134_p9 = pnand %p5132_p5, %p6539_p3  ;;  %s5138_s27 = scalar_lea.vmem %s5137_s23, 1184 }
 0x141   : > { %p5139_p7 = scmp.lt.s32.totalorder %s633_s22, %s5137_s23  ;;  %p5140_p13 = scmp.lt.s32.totalorder %s5138_s27, %s5131_s1 }
 0x142   : > { %p5135_p8 = pneg %p5134_p9 }
 0x143   : > { %p5141_p6 = por %p5140_p13, %p5139_p7 }
 0x145   : > { %p5142_p12 = pnand %p5141_p6, %p5135_p8 }
 0x147   : > { %5145 = shalt.err (!%p5142_p12)
}
 0x148   : > { %4679 = dma.hbm_to_vmem [thread:$0]  (!%p6537_p1), %s5744_s13, 592, %s633_s22, %s5608_s24  }
 0x149   : > { %s6540_s18 = sld [smem:[#allocation34_spill]] }
 0x14f   : > { %p6541_p11 = scmp.ne.s32.totalorder %s6540_s18, 0 }
 0x150   : > { %p6542_p2 = scmp.eq.s32.totalorder (!%p6541_p11), %s5436_s0, 0 }
 0x151   : > { %641 = sbr.rel (%p6541_p11) target bundleno = 3379 (0xd33), region = 84 }
 0x158   : > { %5243 = dma.done.wait (%p6542_p2), [#allocation4], 384   ;;  %p6543_p10 = pmov %p6542_p2 }
 0x159   : > { %p6544_p4 = pmov %p6542_p2 }
 0x15a   : > { %5245 = vsyncadd (%p6543_p10), [#allocation4], 4294966912 }
 0x15b   : > { %5247 = dma.done.wait (%p6544_p4), [#allocation7], 640   ;;  %p6545_p0 = pmov %p6542_p2 }
 0x15d   : > { %5249 = vsyncadd (%p6545_p0), [#allocation7], 4294966656  ;;  %p6546_p5 = pmov %p6545_p0 }
 0x15e   : > { %p6547_p1 = pmov %p6545_p0 }
 0x15f   : > { %5251 = dma.done.wait (%p6546_p5), [#allocation10], 2048  }
 0x160   : > { %5253 = vsyncadd (%p6547_p1), [#allocation10], 4294965248  ;;  %p6548_p3 = pmov %p6545_p0 }
 0x161   : > { %p6549_p9 = pmov %p6545_p0 }
 0x162   : > { %5255 = dma.done.wait (%p6548_p3), [#allocation13], 384  }
 0x163   : > { %5257 = vsyncadd (%p6549_p9), [#allocation13], 4294966912  ;;  %p6550_p8 = pmov %p6545_p0 }
 0x164   : > { %p6551_p7 = pmov %p6545_p0 }
 0x165   : > { %5259 = dma.done.wait (%p6550_p8), [#allocation16], 128  }
 0x166   : > { %5261 = vsyncadd (%p6551_p7), [#allocation16], 4294967168  ;;  %s679_s24 = sand.u32 1, %s5436_s0   ;;  %s5790_s6 = sand.u32 1, %s5280_s28  }
 0x167   : > { %s4593_s19 = smul.u32 296, %s5790_s6  ;;  %s680_s17 = scalar_lea.sflag [#allocation19], %s679_s24 }
 0x168   : > { %p6552_p13 = scmp.ne.s32.totalorder %s6525_s12, 0 }
 0x169   : > { %s5793_s20 = scalar_lea.vmem [#allocation18], %s4593_s19 }
 0x16a   : > { %5263 = dma.done.wait (%p6552_p13), %s680_s17, 5328  }
 0x16b   : > { %5265 = vsyncadd (%p6552_p13), %s680_s17, 4294961968  ;;  %s4594_s14 = smul.u32 37, %s5790_s6  ;;  %p6553_p6 = scmp.ne.s32.totalorder %s5436_s0, 0 }
 0x16c   : > { %s6554_s2 = sld [smem:[#allocation41_spill]] (!%p6553_p6)  ;;  %v5306_v2 = vmov (!%p6553_p6), 0.0|0.0   ;;  %vm5307_vm0 = vmmov (!%p6553_p6), 0   ;;  %v5308_v4 = vmov (!%p6553_p6), 0.0   ;;  %v5830_v6 = vld [vmem:[#allocation3] sm:$0xff] (!%p6553_p6)  ;;  %vm765_vm1 = vcmask (!%p6553_p6), 195584  }
 0x16d   : > { %s5800_s13 = scalar_lea.vmem [#allocation20], %s4594_s14  ;;  %s5802_s21 = scalar_lea.vmem [#allocation21], %s4594_s14  ;;  %4495 = vmatprep.subr.bf16.mxu0 (!%p6553_p6), %v5306_v2  ;;  %4260 = vmatprep.mubr.msk.f32.mxu0 (!%p6553_p6), %vm5307_vm0, %v5308_v4  ;;  %v5838_v7 = vld [vmem:[#allocation3 + $0x8] sm:$0xff] (!%p6553_p6)  ;;  %v5844_v8 = vld [vmem:[#allocation3 + $0x10] sm:$0xff] (!%p6553_p6)  ;;  %v859_v10 = vld [vmem:[#allocation8 + $0x8] sm:$0xff] (!%p6553_p6)  ;;  %vm864_vm2 = vcmask (!%p6553_p6), 130048   ;;  %v860_v33 = vlaneseq (!%p6553_p6) }
 0x16e   : > { %757 = sbr.rel (%p6553_p6) target bundleno = 3057 (0xbf1), region = 132  ;;  %4498 = vmatprep.subr.bf16.mxu1 (!%p6553_p6), %v5306_v2  ;;  %4273 = vmatprep.mubr.msk.f32.mxu1 (!%p6553_p6), %vm5307_vm0, %v5308_v4  ;;  %v858_v9 = vld [vmem:[#allocation8] sm:$0xff] (!%p6553_p6)  ;;  %v957_v12 = vld [vmem:[#allocation9] sm:$0xff] (!%p6553_p6)  ;;  %v958_v13 = vld [vmem:[#allocation9 + $0x8] sm:$0xff] (!%p6553_p6)  ;;  %vm969_vm3 = vcmask (!%p6553_p6), 523264   ;;  %s6555_s16 = sld [smem:[#allocation43_spill]] (!%p6553_p6) }
 0x16f   : > { %v4499_v11 = vpack.c.bf16 (!%p6553_p6), %v859_v10, %v858_v9  ;;  %v4502_v15 = vpack.c.bf16 (!%p6553_p6), %v958_v13, %v957_v12  ;;  %v959_v18 = vld [vmem:[#allocation9 + $0x10] sm:$0xff] (!%p6553_p6)  ;;  %v960_v19 = vld [vmem:[#allocation9 + $0x18] sm:$0xff] (!%p6553_p6)  ;;  %v961_v24 = vld [vmem:[#allocation9 + $0x20] sm:$0xff] (!%p6553_p6)  ;;  %v5868_v34 = vshrl.u32 (!%p6553_p6), %v860_v33, 7  ;;  %vm5309_vm5 = vmmov (!%p6553_p6), 1   ;;  %s6556_s27 = sld [smem:[#allocation46_spill]] (!%p6553_p6) }
 0x170   : > { %v4505_v21 = vpack.c.bf16 (!%p6553_p6), %v960_v19, %v959_v18  ;;  %v962_v25 = vld [vmem:[#allocation9 + $0x28] sm:$0xff] (!%p6553_p6)  ;;  %v963_v30 = vld [vmem:[#allocation9 + $0x30] sm:$0xff] (!%p6553_p6)  ;;  %v964_v31 = vld [vmem:[#allocation9 + $0x38] sm:$0xff] (!%p6553_p6)  ;;  %vm1376_vm9 = vcmask (!%p6553_p6), 261120   ;;  %s6558_s22 = sld [smem:[#allocation47_spill]] (!%p6553_p6)  ;;  %s6559_s12 = sld [smem:[#allocation48_spill]] (!%p6553_p6) }
 0x171   : > { %4500 = vmatpush3.bf16.msra.mxu1 (!%p6553_p6), %v4499_v11  ;;  %v4508_v27 = vpack.c.bf16 (!%p6553_p6), %v962_v25, %v961_v24  ;;  %v4511_v32 = vpack.c.bf16 (!%p6553_p6), %v964_v31, %v963_v30  ;;  %v862_v35 = vsub.s32 (!%p6553_p6), 0, %v5868_v34  ;;  %v5871_v36 = vld [vmem:[#allocation12] sm:$0x1f] (!%p6553_p6)  ;;  %v967_v50 = vsub.s32 (!%p6553_p6), 1, %v5868_v34  ;;  %v1146_v9 = vld [vmem:[#allocation11 + $0x8] sm:$0xff] (!%p6553_p6)  ;;  %v1147_v12 = vld [vmem:[#allocation11 + $0x10] sm:$0xff] (!%p6553_p6) }
 0x172   : > { %v5809_v0 = vld [vmem:[%s6554_s2] sm:$0xff] (!%p6553_p6)  ;;  %v5814_v1 = vld [vmem:[%s6554_s2 + $0x8] sm:$0xff] (!%p6553_p6)  ;;  %v5828_v5 = vld [vmem:[%s6554_s2 + $0x10] sm:$0xff] (!%p6553_p6)  ;;  %4501 = vmatprep.subr.bf16.mxu1 (!%p6553_p6), %v5306_v2 }
 0x173   : > { %v4496_v3 = vpack.c.bf16 (!%p6553_p6), %v5814_v1, %v5809_v0  ;;  %v863_v37 = vrot.slane (!%p6553_p6), %v5871_v36, %v862_v35  ;;  %v968_v51 = vrot.slane (!%p6553_p6), %v5871_v36, %v967_v50  ;;  %v1148_v13 = vld [vmem:[#allocation11 + $0x18] sm:$0xff] (!%p6553_p6) }
 0x174   : > { %v1152_v18 = vld [vmem:[#allocation11 + $0x38] sm:$0xff] (!%p6553_p6)  ;;  %v1273_v25 = vld [vmem:[%s6555_s16 + $0x28] sm:$0xff] (!%p6553_p6) }
 0x175   : > { %4497 = vmatpush3.bf16.msra.mxu0 %v4496_v3  ;;  %v1145_v3 = vld [vmem:[#allocation11] sm:$0xff]  ;;  %s6557_s18 = smov %s6556_s27 }
 0x176   : > { %4258 = vmatprep.subr.mxu0 %v5308_v4  ;;  %v4517_v11 = vpack.c.bf16 %v1146_v9, %v1145_v3  ;;  %v1272_v24 = vld [vmem:[%s6555_s16 + $0x20] sm:$0xff] }
 0x179   : > { %4259 = vmatpush3.msra.mxu0 %v5828_v5 }
 0x17a   : > { %4261 = vmatmul.mubr.msk.f32.vlgmr.msra.gmra.mrb[0].mxu0 %vm765_vm1, %v5830_v6  ;;  %4513 = vmatprep.subr.bf16.mxu0 %v5306_v2 }
 0x17b   : > { %4263 = vmatprep.mubr.msk.f32.mxu0 %vm5307_vm0, %v5308_v4 }
 0x17e   : > { %4264 = vmatmul.mubr.msk.f32.gmra.mrb[2].mxu0 %vm765_vm1, %v5838_v7 }
 0x17f   : > { %4266 = vmatprep.mubr.msk.f32.mxu0 %vm5307_vm0, %v5308_v4 }
 0x182   : > { %4267 = vmatmul.mubr.msk.f32.gmra.mrb[4].mxu0 %vm765_vm1, %v5844_v8 }
 0x183   : > { %4313 = vmatprep.mubr.msk.f32.mxu0 %vm5307_vm0, %v5308_v4 }
 0x24d   : > { %v841_v14 = vpop.f32.mrb[0].mxu0 }
 0x24e   : > { %v855_v16 = vadd.f32 %v841_v14, %v5809_v0  ;;  %v4262_v17 = vpop.f32.mrb[1].mxu0  ;;  %v4520_v14 = vpack.c.bf16 %v1148_v13, %v1147_v12 }
 0x250   : > { %4274 = vmatmul.mubr.msk.f32.vlgmr.msra.gmra.mrb[0].mxu1 %vm864_vm2, %v855_v16  ;;  %v1150_v16 = vld [vmem:[#allocation11 + $0x28] sm:$0xff] }
 0x251   : > { %v846_v20 = vpop.f32.mrb[2].mxu0  ;;  %4276 = vmatprep.mubr.msk.f32.mxu1 %vm5307_vm0, %v5308_v4  ;;  %4503 = vmatpush3.bf16.msra.mxu1 %v4502_v15  ;;  %v1149_v15 = vld [vmem:[#allocation11 + $0x20] sm:$0xff] }
 0x252   : > { %v856_v22 = vadd.f32 %v846_v20, %v5814_v1  ;;  %v4265_v23 = vpop.f32.mrb[3].mxu0  ;;  %4504 = vmatprep.subr.bf16.mxu1 %v5306_v2  ;;  %v4523_v17 = vpack.c.bf16 %v1150_v16, %v1149_v15  ;;  %v1270_v20 = vld [vmem:[%s6555_s16 + $0x10] sm:$0xff] }
 0x254   : > { %4277 = vmatmul.mubr.msk.f32.gmra.mrb[2].mxu1 %vm864_vm2, %v856_v22  ;;  %v1271_v22 = vld [vmem:[%s6555_s16 + $0x18] sm:$0xff] }
 0x255   : > { %v851_v26 = vpop.f32.mrb[4].mxu0  ;;  %4279 = vmatprep.mubr.msk.f32.mxu1 %vm5307_vm0, %v5308_v4  ;;  %4506 = vmatpush3.bf16.msra.mxu1 %v4505_v21  ;;  %v4532_v23 = vpack.c.bf16 %v1271_v22, %v1270_v20  ;;  %v1251_v22 = vadd.s32 8, %v5868_v34 }
 0x256   : > { %v857_v28 = vadd.f32 %v851_v26, %v5828_v5  ;;  %v4268_v29 = vpop.f32.mrb[5].mxu0  ;;  %4507 = vmatprep.subr.bf16.mxu1 %v5306_v2  ;;  %v4535_v26 = vpack.c.bf16 %v1273_v25, %v1272_v24 }
 0x258   : > { %4280 = vmatmul.mubr.msk.f32.gmra.mrb[4].mxu1 %vm864_vm2, %v857_v28  ;;  %v1381_v28 = vld [vmem:[#allocation14 + $0x8] sm:$0xff] }
 0x259   : > { %4509 = vmatpush3.bf16.msra.mxu1 %v4508_v27  ;;  %4298 = vmatprep.mubr.msk.f32.mxu1 %vm5307_vm0, %v5308_v4  ;;  %v1380_v27 = vld [vmem:[#allocation14] sm:$0xff] }
 0x25a   : > { %4510 = vmatprep.subr.bf16.mxu1 %v5306_v2  ;;  %v4541_v30 = vpack.c.bf16 %v1381_v28, %v1380_v27 }
 0x25d   : > { %4512 = vmatpush3.bf16.msra.mxu1 %v4511_v32 }
 0x25e   : > { %4528 = vmatprep.subr.bf16.mxu1 %v5306_v2 }
 0x323   : > { %v940_v38 = vpop.f32.mrb[0].mxu1 }
 0x324   : > { %v941_v39 = vadd.f32 %v940_v38, %v863_v37  ;;  %v4275_v40 = vpop.f32.mrb[1].mxu1 }
 0x326   : > { %v954_v41 = vmax.f32 %v941_v39, 0.0 }
 0x327   : > { %v945_v42 = vpop.f32.mrb[2].mxu1 }
 0x328   : > { %v946_v43 = vadd.f32 %v945_v42, %v863_v37  ;;  %v4278_v44 = vpop.f32.mrb[3].mxu1  ;;  %4299 = vmatmul.mubr.msk.f32.vlgmr.msra.gmra.mrb[6].mxu1 %vm969_vm3, %v954_v41 }
 0x329   : > { %4301 = vmatprep.mubr.msk.f32.mxu1 %vm5307_vm0, %v5308_v4 }
 0x32a   : > { %v955_v45 = vmax.f32 %v946_v43, 0.0  ;;  %v1274_v43 = vld [vmem:[%s6555_s16 + $0x30] sm:$0xff] }
 0x32b   : > { %v950_v46 = vpop.f32.mrb[4].mxu1 }
 0x32c   : > { %v951_v47 = vadd.f32 %v950_v46, %v863_v37  ;;  %4302 = vmatmul.mubr.msk.f32.gmra.mrb[8].mxu1 %vm969_vm3, %v955_v45  ;;  %v4281_v48 = vpop.f32.mrb[5].mxu1 }
 0x32d   : > { %4304 = vmatprep.mubr.msk.f32.mxu1 %vm5307_vm0, %v5308_v4 }
 0x32e   : > { %v956_v49 = vmax.f32 %v951_v47, 0.0 }
 0x330   : > { %4305 = vmatmul.mubr.msk.f32.gmra.mrb[10].mxu1 %vm969_vm3, %v956_v49 }
 0x331   : > { %4363 = vmatprep.mubr.msk.f32.mxu1 %vm5307_vm0, %v5308_v4 }
 0x3fb   : > { %v1045_v52 = vpop.f32.mrb[6].mxu1 }
 0x3fc   : > { %v4300_v53 = vpop.f32.mrb[7].mxu1  ;;  %v1046_v54 = vadd.f32 %v1045_v52, %v968_v51 }
 0x3fe   : > { %v1059_v58 = vmax.f32 %v1046_v54, 0.0  ;;  %v5972_v54 = vld [vmem:[#allocation15] sm:$0x7] }
 0x3ff   : > { %v1050_v55 = vpop.f32.mrb[8].mxu1 }
 0x400   : > { %v5889_v56 = vadd.f32 %v1050_v55, %v968_v51  ;;  %v4303_v57 = vpop.f32.mrb[9].mxu1 }
 0x402   : > { %v1060_v59 = vmax.f32 %v5889_v56, 0.0 }
 0x403   : > { %v1055_v60 = vpop.f32.mrb[10].mxu1 }
 0x404   : > { %v4514_v61 = vpack.c.bf16 %v1060_v59, %v1059_v58  ;;  %v5892_v62 = vadd.f32 %v1055_v60, %v968_v51  ;;  %v4306_v63 = vpop.f32.mrb[11].mxu1  ;;  %v1491_v60 = vrot.slane %v5972_v54, %v967_v50 }
 0x406   : > { %v1061_v10 = vmax.f32 %v5892_v62, 0.0  ;;  %4515 = vmatpush3.bf16.msra.mxu0 %v4514_v61 }
 0x407   : > { %4311 = vmatprep.subr.mxu0 %v5308_v4 }
 0x40a   : > { %4312 = vmatpush3.msra.mxu0 %v1061_v10 }
 0x40b   : > { %4314 = vmatmul.mubr.msk.f32.vlgmr.msra.gmra.mrb[6].mxu0 %vm765_vm1, %v5830_v6  ;;  %4516 = vmatprep.subr.bf16.mxu0 %v5306_v2  ;;  %v1151_v6 = vld [vmem:[#allocation11 + $0x30] sm:$0xff] }
 0x40c   : > { %4316 = vmatprep.mubr.msk.f32.mxu0 %vm5307_vm0, %v5308_v4  ;;  %4518 = vmatpush3.bf16.msra.mxu0 %v4517_v11  ;;  %v4526_v19 = vpack.c.bf16 %v1152_v18, %v1151_v6 }
 0x40d   : > { %4519 = vmatprep.subr.bf16.mxu0 %v5306_v2 }
 0x40f   : > { %4317 = vmatmul.mubr.msk.f32.gmra.mrb[8].mxu0 %vm765_vm1, %v5838_v7  ;;  %v1268_v7 = vld [vmem:[%s6555_s16] sm:$0xff] }
 0x410   : > { %4319 = vmatprep.mubr.msk.f32.mxu0 %vm5307_vm0, %v5308_v4  ;;  %4521 = vmatpush3.bf16.msra.mxu0 %v4520_v14  ;;  %v1475_v14 = vrot.slane %v5972_v54, %v862_v35 }
 0x411   : > { %4522 = vmatprep.subr.bf16.mxu0 %v5306_v2 }
 0x413   : > { %4320 = vmatmul.mubr.msk.f32.gmra.mrb[10].mxu0 %vm765_vm1, %v5844_v8  ;;  %v1269_v8 = vld [vmem:[%s6555_s16 + $0x8] sm:$0xff] }
 0x414   : > { %4524 = vmatpush3.bf16.msra.mxu0 %v4523_v17  ;;  %4338 = vmatprep.mubr.msk.f32.mxu0 %vm5307_vm0, %v5308_v4  ;;  %v4529_v21 = vpack.c.bf16 %v1269_v8, %v1268_v7 }
 0x415   : > { %4525 = vmatprep.subr.bf16.mxu0 %v5306_v2 }
 0x416   : > { %4530 = vmatpush3.bf16.msra.mxu1 %v4529_v21 }
 0x417   : > { %4531 = vmatprep.subr.bf16.mxu1 %v5306_v2 }
 0x418   : > { %4527 = vmatpush3.bf16.msra.mxu0 %v4526_v19 }
 0x419   : > { %4540 = vmatprep.subr.bf16.mxu0 %v5306_v2 }
 0x41a   : > { %4533 = vmatpush3.bf16.msra.mxu1 %v4532_v23  ;;  %v1252_v23 = vadd.s32 16, %v5868_v34 }
 0x41b   : > { %4534 = vmatprep.subr.bf16.mxu1 %v5306_v2 }
 0x41e   : > { %4536 = vmatpush3.bf16.msra.mxu1 %v4535_v26 }
 0x41f   : > { %4537 = vmatprep.subr.bf16.mxu1 %v5306_v2 }
 0x4de   : > { %v1128_v29 = vpop.f32.mrb[6].mxu0 }
 0x4df   : > { %v1142_v31 = vadd.f32 %v1128_v29, %v1059_v58  ;;  %v4315_v32 = vpop.f32.mrb[7].mxu0 }
 0x4e1   : > { %4339 = vmatmul.mubr.msk.f32.vlgmr.msra.gmra.mrb[12].mxu0 %vm969_vm3, %v1142_v31 }
 0x4e2   : > { %v1133_v37 = vpop.f32.mrb[8].mxu0  ;;  %4341 = vmatprep.mubr.msk.f32.mxu0 %vm5307_vm0, %v5308_v4  ;;  %4542 = vmatpush3.bf16.msra.mxu0 %v4541_v30 }
 0x4e3   : > { %v1143_v38 = vadd.f32 %v1133_v37, %v1060_v59  ;;  %v4318_v39 = vpop.f32.mrb[9].mxu0  ;;  %4546 = vmatprep.subr.bf16.mxu0 %v5306_v2 }
 0x4e4   : > { %v1278_v39 = vsub.s32 3, %v5868_v34 }
 0x4e5   : > { %4342 = vmatmul.mubr.msk.f32.gmra.mrb[14].mxu0 %vm969_vm3, %v1143_v38  ;;  %v5310_v38 = vmov 1.0  }
 0x4e6   : > { %v1138_v40 = vpop.f32.mrb[10].mxu0  ;;  %4344 = vmatprep.mubr.msk.f32.mxu0 %vm5307_vm0, %v5308_v4 }
 0x4e7   : > { %v1144_v41 = vadd.f32 %v1138_v40, %v1061_v10  ;;  %v4321_v42 = vpop.f32.mrb[11].mxu0  ;;  %v1279_v40 = vrot.slane %v5871_v36, %v1278_v39 }
 0x4e9   : > { %4345 = vmatmul.mubr.msk.f32.gmra.mrb[16].mxu0 %vm969_vm3, %v1144_v41  ;;  %v1282_v41 = vsub.s32 4, %v5868_v34 }
 0x4ea   : > { %4376 = vmatprep.mubr.msk.f32.mxu0 %vm5307_vm0, %v5308_v4 }
 0x4ed   : > { %4377 = vmatmul.mubr.msk.f32.vlgmr.msra.gmra.mrb[18].mxu0 %vm864_vm2, %v5809_v0  ;;  %v1275_v0 = vld [vmem:[%s6555_s16 + $0x38] sm:$0xff] }
 0x4ee   : > { %4379 = vmatprep.mubr.msk.f32.mxu0 %vm5307_vm0, %v5308_v4  ;;  %v4538_v44 = vpack.c.bf16 %v1275_v0, %v1274_v43 }
 0x4f0   : > { %4539 = vmatpush3.bf16.msra.mxu1 %v4538_v44  ;;  %v1283_v44 = vrot.slane %v5871_v36, %v1282_v41 }
 0x4f1   : > { %4380 = vmatmul.mubr.msk.f32.gmra.mrb[20].mxu0 %vm864_vm2, %v5814_v1  ;;  %4543 = vmatprep.subr.bf16.mxu1 %v5306_v2  ;;  %v5964_v1 = vand.u32 127, %v860_v33 }
 0x4f2   : > { %4382 = vmatprep.mubr.msk.f32.mxu0 %vm5307_vm0, %v5308_v4 }
 0x4f3   : > { %vm1258_vm4 = vcmp.lt.s32.totalorder %v5964_v1, 32  ;;  %vm1504_vm10 = vcmp.eq.s32.totalorder %v5868_v34, %v5964_v1  ;;  %vm1505_vm11 = vcmp.eq.s32.totalorder %v1251_v22, %v5964_v1  ;;  %vm1506_vm12 = vcmp.eq.s32.totalorder %v1252_v23, %v5964_v1 }
 0x4f4   : > { %vm1259_vm6 = vmxor %vm5309_vm5, %vm1258_vm4  ;;  %v4070_v25 = vsel %vm1504_vm10, 1.0, %v5308_v4  ;;  %v4071_v26 = vsel %vm1505_vm11, 1.0, %v5308_v4  ;;  %v4072_v30 = vsel %vm1506_vm12, 1.0, %v5308_v4 }
 0x4f5   : > { %4383 = vmatmul.mubr.msk.f32.gmra.mrb[22].mxu0 %vm864_vm2, %v5828_v5  ;;  %v1155_v5 = vsub.s32 2, %v5868_v34  ;;  %vm1262_vm7 = vmxor %vm1259_vm6, %vm5309_vm5 }
 0x4f6   : > { %4406 = vmatprep.mubr.msk.f32.mxu0 %vm5307_vm0, %v5308_v4  ;;  %vm1263_vm8 = vmxor %vm1258_vm4, %vm5309_vm5 }
 0x4f7   : > { %v1156_v45 = vrot.slane %v5871_v36, %v1155_v5 }
 0x5b4   : > { %v1232_v46 = vpop.f32.mrb[12].mxu0 }
 0x5b5   : > { %v1233_v47 = vadd.f32 %v1232_v46, %v1156_v45  ;;  %v4340_v48 = vpop.f32.mrb[13].mxu0 }
 0x5b7   : > { %v1246_v49 = vmax.f32 %v1233_v47, 0.0 }
 0x5b8   : > { %v1237_v51 = vpop.f32.mrb[14].mxu0 }
 0x5b9   : > { %v1265_v52 = vsel %vm1262_vm7, %v1246_v49, 0.0  ;;  %v1238_v53 = vadd.f32 %v1237_v51, %v1156_v45  ;;  %v4343_v33 = vpop.f32.mrb[15].mxu0 }
 0x5ba   : > { %4364 = vmatmul.mubr.msk.f32.vlgmr.msra.gmra.mrb[12].mxu1 %vm969_vm3, %v1265_v52 }
 0x5bb   : > { %v1247_v55 = vmax.f32 %v1238_v53, 0.0  ;;  %4366 = vmatprep.mubr.msk.f32.mxu1 %vm5307_vm0, %v5308_v4 }
 0x5bc   : > { %v1242_v56 = vpop.f32.mrb[16].mxu0 }
 0x5bd   : > { %v1266_v57 = vsel %vm1263_vm8, %v1247_v55, 0.0  ;;  %v1243_v58 = vadd.f32 %v1242_v56, %v1156_v45  ;;  %v4346_v59 = vpop.f32.mrb[17].mxu0  ;;  %v1611_v55 = vld [vmem:[#allocation6] sm:$0xff] }
 0x5be   : > { %4367 = vmatmul.mubr.msk.f32.gmra.mrb[14].mxu1 %vm969_vm3, %v1266_v57  ;;  %vm1614_vm14 = vcmp.gt.f32.partialorder %v1611_v55, 0.0 }
 0x5bf   : > { %v1248_v61 = vmax.f32 %v1243_v58, 0.0  ;;  %4369 = vmatprep.mubr.msk.f32.mxu1 %vm5307_vm0, %v5308_v4 }
 0x5c0   : > { %v1457_v62 = vpop.f32.mrb[18].mxu0 }
 0x5c1   : > { %v1267_v63 = vsel %vm1263_vm8, %v1248_v61, 0.0  ;;  %v4378_v3 = vpop.f32.mrb[19].mxu0  ;;  %v1492_v9 = vmul.f32 %v1491_v60, %v1457_v62  ;;  %v1476_v8 = vmul.f32 %v1475_v14, %v1457_v62  ;;  %v1612_v61 = vld [vmem:[#allocation6 + $0x8] sm:$0xff] }
 0x5c2   : > { %4370 = vmatmul.mubr.msk.f32.gmra.mrb[16].mxu1 %vm969_vm3, %v1267_v63  ;;  %vm1615_vm2 = vcmp.gt.f32.partialorder %v1612_v61, 0.0 }
 0x5c3   : > { %v1495_v10 = vsel %vm1376_vm9, %v1492_v9, 0.0  ;;  %4391 = vmatprep.mubr.msk.f32.mxu1 %vm5307_vm0, %v5308_v4  ;;  %v1479_v35 = vsel %vm1376_vm9, %v1476_v8, 0.0 }
 0x5c4   : > { %1496 = vadd.xlane.f32.xlu0 %v1495_v10  ;;  %v1462_v50 = vpop.f32.mrb[20].mxu0 }
 0x5c5   : > { %v4547_v11 = vpack.c.bf16 %v1462_v50, %v1457_v62  ;;  %v4381_v12 = vpop.f32.mrb[21].mxu0  ;;  %v1493_v13 = vmul.f32 %v1491_v60, %v1462_v50  ;;  %v1477_v16 = vmul.f32 %v1475_v14, %v1462_v50 }
 0x5c7   : > { %4548 = vmatpush3.bf16.msra.mxu0 %v4547_v11  ;;  %v1498_v15 = vsel %vm1376_vm9, %v1493_v13, 0.0  ;;  %v1482_v19 = vsel %vm1376_vm9, %v1477_v16, 0.0  ;;  %v1613_v13 = vld [vmem:[#allocation6 + $0x10] sm:$0xff] }
 0x5c8   : > { %1499 = vadd.xlane.f32.xlu0 %v1498_v15  ;;  %v1467_v17 = vpop.f32.mrb[22].mxu0  ;;  %4404 = vmatprep.subr.mxu0 %v5308_v4  ;;  %vm1616_vm5 = vcmp.gt.f32.partialorder %v1613_v13, 0.0 }
 0x5c9   : > { %v1494_v6 = vmul.f32 %v1491_v60, %v1467_v17  ;;  %v4384_v18 = vpop.f32.mrb[23].mxu0  ;;  %v1478_v20 = vmul.f32 %v1475_v14, %v1467_v17 }
 0x5cb   : > { %v1501_v7 = vsel %vm1376_vm9, %v1494_v6, 0.0  ;;  %4405 = vmatpush3.msra.mxu0 %v1467_v17  ;;  %v1485_v21 = vsel %vm1376_vm9, %v1478_v20, 0.0 }
 0x5cc   : > { %1483 = vadd.xlane.f32.xlu0 %v1482_v19  ;;  %1502 = vadd.xlane.f32.xlu1 %v1501_v7 }
 0x5cd   : > { %4561 = vmatprep.subr.bf16.mxu0 %v5306_v2 }
 0x5d0   : > { %1480 = vadd.xlane.f32.xlu1 %v1479_v35 }
 0x5d4   : > { %1486 = vadd.xlane.f32.xlu1 %v1485_v21 }
 0x651   : > { %v1497_v24 = vpop.xlane.xlu0 %1496 }
 0x652   : > { %v1513_v28 = vmul.f32 %v4070_v25, %v1497_v24 }
 0x655   : > { %v1500_v27 = vpop.xlane.xlu0 %1499 }
 0x656   : > { %v1514_v29 = vmul.f32 %v4071_v26, %v1500_v27 }
 0x658   : > { %v4544_v31 = vpack.c.bf16 %v1514_v29, %v1513_v28 }
 0x659   : > { %v1503_v32 = vpop.xlane.xlu1 %1502  ;;  %v1484_v59 = vpop.xlane.xlu0 %1483 }
 0x65a   : > { %v1515_v37 = vmul.f32 %v4072_v30, %v1503_v32  ;;  %4545 = vmatpush3.bf16.msra.mxu1 %v4544_v31 }
 0x65b   : > { %4389 = vmatprep.subr.mxu1 %v5308_v4 }
 0x65d   : > { %v1481_v36 = vpop.xlane.xlu1 %1480 }
 0x65e   : > { %4390 = vmatpush3.msra.mxu1 %v1515_v37 }
 0x65f   : > { %4392 = vmatmul.mubr.msk.f32.vlgmr.msra.gmra.mrb[18].mxu1 %vm765_vm1, %v5310_v38  ;;  %4549 = vmatprep.subr.bf16.mxu1 %v5306_v2 }
 0x660   : > { %4394 = vmatprep.mubr.msk.f32.mxu1 %vm5307_vm0, %v5308_v4 }
 0x661   : > { %v1487_v11 = vpop.xlane.xlu1 %1486 }
 0x663   : > { %4395 = vmatmul.mubr.msk.f32.gmra.mrb[20].mxu1 %vm765_vm1, %v5310_v38 }
 0x664   : > { %4397 = vmatprep.mubr.msk.f32.mxu1 %vm5307_vm0, %v5308_v4 }
 0x667   : > { %4398 = vmatmul.mubr.msk.f32.gmra.mrb[22].mxu1 %vm765_vm1, %v5310_v38 }
 0x668   : > { %4423 = vmatprep.mubr.msk.f32.mxu1 %vm5307_vm0, %v5308_v4 }
 0x68d   : > { %v1362_v42 = vpop.f32.mrb[12].mxu1 }
 0x68e   : > { %v6019_v43 = vadd.f32 %v1362_v42, %v1279_v40  ;;  %v4365_v0 = vpop.f32.mrb[13].mxu1 }
 0x690   : > { %1377 = vst.msk [vmem:[#allocation22] sm:$0xff] %vm1376_vm9, %v6019_v43 }
 0x691   : > { %v1367_v1 = vpop.f32.mrb[14].mxu1 }
 0x692   : > { %v1368_v45 = vadd.f32 %v1367_v1, %v1283_v44  ;;  %v4368_v46 = vpop.f32.mrb[15].mxu1 }
 0x693   : > { %v1790_v46 = vld [vmem:[%s6557_s18 + $0x48] sm:$0xff] }
 0x694   : > { %1378 = vst.msk [vmem:[#allocation24] sm:$0xff] %vm1376_vm9, %v1368_v45  ;;  %v1756_v51 = vsel %vm1376_vm9, %v1368_v45, 0.0  ;;  %v1789_v45 = vld [vmem:[%s6556_s27 + $0x40] sm:$0xff] }
 0x695   : > { %v1372_v47 = vpop.f32.mrb[16].mxu1 }
 0x696   : > { %v1373_v48 = vadd.f32 %v1372_v47, %v1283_v44  ;;  %v4371_v49 = vpop.f32.mrb[17].mxu1 }
 0x698   : > { %1379 = vst.msk [vmem:[#allocation24 + $0x8] sm:$0xff] %vm1376_vm9, %v1373_v48  ;;  %v1757_v52 = vsel %vm1376_vm9, %v1373_v48, 0.0  ;;  %v4562_v48 = vpack.c.bf16 %v1790_v46, %v1789_v45 }
 0x699   : > { %v6028_v53 = vadd.f32 %v1757_v52, %v1756_v51  ;;  %v1791_v52 = vld [vmem:[%s6557_s18 + $0x50] sm:$0xff] }
 0x69b   : > { %v1759_v42 = vrot.slane %v6028_v53, 4 }
 0x69d   : > { %v1760_v44 = vadd.f32 %v1759_v42, %v6028_v53  ;;  %v1792_v53 = vld [vmem:[%s6557_s18 + $0x58] sm:$0xff] }
 0x69f   : > { %v1761_v49 = vrot.slane %v1760_v44, 2 }
 0x732   : > { %v1585_v33 = vpop.f32.mrb[18].mxu1 }
 0x733   : > { %v1599_v56 = vadd.f32 %v1585_v33, %v1481_v36  ;;  %v4393_v57 = vpop.f32.mrb[19].mxu1  ;;  %v4565_v33 = vpack.c.bf16 %v1792_v53, %v1791_v52  ;;  %v2093_v53 = vld [vmem:[%s6558_s22] sm:$0xff] }
 0x735   : > { %v1605_v58 = vmul.f32 0.2, %v1599_v56  ;;  %vm1602_vm13 = vcmp.gt.f32.partialorder %v1599_v56, 0.0 }
 0x736   : > { %v1590_v60 = vpop.f32.mrb[20].mxu1 }
 0x737   : > { %v1600_v62 = vadd.f32 %v1590_v60, %v1484_v59  ;;  %v4396_v63 = vpop.f32.mrb[21].mxu1  ;;  %v1608_v3 = vsel %vm1602_vm13, %v1599_v56, %v1605_v58 }
 0x738   : > { %v1617_v9 = vsel %vm1614_vm14, %v1608_v3, -1e+30  ;;  %v1787_v3 = vld [vmem:[%s6557_s18 + $0x30] sm:$0xff] }
 0x739   : > { %v1606_v10 = vmul.f32 0.2, %v1600_v62  ;;  %v1620_v50 = vsel %vm765_vm1, %v1617_v9, -inf  ;;  %vm1603_vm15 = vcmp.gt.f32.partialorder %v1600_v62, 0.0 }
 0x73a   : > { %v1595_v12 = vpop.f32.mrb[22].mxu1  ;;  %1621 = vmax.xlane.f32.xlu0 %v1620_v50  ;;  %v1659_v50 = vrot.slane %v5972_v54, %v1155_v5 }
 0x73b   : > { %v1601_v14 = vadd.f32 %v1595_v12, %v1487_v11  ;;  %v1609_v15 = vsel %vm1603_vm15, %v1600_v62, %v1606_v10  ;;  %v4399_v16 = vpop.f32.mrb[23].mxu1  ;;  %v1786_v62 = vld [vmem:[%s6557_s18 + $0x28] sm:$0xff]  ;;  %v1749_v11 = vsel %vm1376_vm9, %v6019_v43, 0.0  ;;  %v1781_v43 = vld [vmem:[%s6557_s18] sm:$0xff] }
 0x73c   : > { %v1618_v17 = vsel %vm1615_vm2, %v1609_v15, -1e+30  ;;  %v1750_v15 = vrot.slane %v1749_v11, 4 }
 0x73d   : > { %v1607_v6 = vmul.f32 0.2, %v1601_v14  ;;  %v1623_v18 = vsel %vm765_vm1, %v1618_v17, -inf  ;;  %vm1604_vm4 = vcmp.gt.f32.partialorder %v1601_v14, 0.0 }
 0x73e   : > { %1624 = vmax.xlane.f32.xlu1 %v1623_v18 }
 0x73f   : > { %v1610_v19 = vsel %vm1604_vm4, %v1601_v14, %v1607_v6 }
 0x740   : > { %v1619_v7 = vsel %vm1616_vm5, %v1610_v19, -1e+30  ;;  %v1751_v19 = vadd.f32 %v1750_v15, %v1749_v11  ;;  %v1797_v15 = vld [vmem:[#allocation17] sm:$0x7] }
 0x741   : > { %v1626_v8 = vsel %vm765_vm1, %v1619_v7, -inf }
 0x742   : > { %1627 = vmax.xlane.f32.xlu0 %v1626_v8  ;;  %v1752_v5 = vrot.slane %v1751_v19, 2 }
 0x7c7   : > { %v1622_v35 = vpop.xlane.xlu0 %1621 }
 0x7c8   : > { %v1629_v20 = vsub.f32 %v1617_v9, %v1622_v35  ;;  %v1788_v9 = vld [vmem:[%s6557_s18 + $0x38] sm:$0xff] }
 0x7c9   : > { %v4553_v10 = vpack.c.bf16 %v1788_v9, %v1787_v3  ;;  %v2179_v3 = vld [vmem:[%s6559_s12 + $0x8] sm:$0xff] }
 0x7ca   : > { %v1632_v21 = vmul.f32 1.442695, %v1629_v20 }
 0x7cb   : > { %v1625_v22 = vpop.xlane.xlu1 %1624 }
 0x7cc   : > { %4767 = vpow2.f32 %v1632_v21  ;;  %v1630_v23 = vsub.f32 %v1618_v17, %v1625_v22  ;;  %v1782_v22 = vld [vmem:[%s6557_s18 + $0x8] sm:$0xff] }
 0x7ce   : > { %v1634_v24 = vmul.f32 1.442695, %v1630_v23 }
 0x7cf   : > { %v1628_v25 = vpop.xlane.xlu0 %1627 }
 0x7d0   : > { %4769 = vpow2.f32 %v1634_v24  ;;  %v1631_v26 = vsub.f32 %v1619_v7, %v1628_v25 }
 0x7d2   : > { %v1636_v27 = vmul.f32 1.442695, %v1631_v26 }
 0x7d4   : > { %4771 = vpow2.f32 %v1636_v27 }
 0x7d6   : > { %v4768_v28 = vpop.eup %4767 }
 0x7d7   : > { %v1638_v29 = vmul.f32 %v4768_v28, %v1611_v55  ;;  %v1762_v55 = vadd.f32 %v1761_v49, %v1760_v44  ;;  %v1794_v44 = vld [vmem:[%s6557_s18 + $0x68] sm:$0xff] }
 0x7d9   : > { %v1641_v30 = vsel %vm765_vm1, %v1638_v29, 0.0  ;;  %v1763_v58 = vrot.slane %v1762_v55, 1 }
 0x7da   : > { %v4770_v31 = vpop.eup %4769  ;;  %1642 = vadd.xlane.f32.xlu1 %v1641_v30  ;;  %v1753_v30 = vadd.f32 %v1752_v5, %v1751_v19  ;;  %v2180_v19 = vld [vmem:[%s6559_s12 + $0x10] sm:$0xff]  ;;  %v2182_v5 = vrot.slane %v1797_v15, 2 }
 0x7db   : > { %v1639_v32 = vmul.f32 %v4770_v31, %v1612_v61  ;;  %v1764_v60 = vadd.f32 %v1763_v58, %v1762_v55  ;;  %v1785_v61 = vld [vmem:[%s6557_s18 + $0x20] sm:$0xff]  ;;  %v2095_v55 = vld [vmem:[%s6558_s22 + $0x10] sm:$0xff]  ;;  %v2098_v58 = vld [vmem:[%s6558_s22 + $0x28] sm:$0xff] }
 0x7dc   : > { %v4550_v63 = vpack.c.bf16 %v1786_v62, %v1785_v61  ;;  %v2100_v61 = vld [vmem:[%s6558_s22 + $0x38] sm:$0xff] }
 0x7dd   : > { %v1644_v37 = vsel %vm765_vm1, %v1639_v32, 0.0 }
 0x7de   : > { %v4772_v38 = vpop.eup %4771  ;;  %1645 = vadd.xlane.f32.xlu0 %v1644_v37  ;;  %4551 = vmatpush3.bf16.msra.mxu1 %v4550_v63  ;;  %v1783_v37 = vld [vmem:[%s6557_s18 + $0x10] sm:$0xff]  ;;  %v2178_v63 = vld [vmem:[%s6559_s12] sm:$0xff] }
 0x7df   : > { %v1640_v39 = vmul.f32 %v4772_v38, %v1613_v13  ;;  %4552 = vmatprep.subr.bf16.mxu1 %v5306_v2  ;;  %v1784_v38 = vld [vmem:[%s6557_s18 + $0x18] sm:$0xff]  ;;  %v4586_v9 = vpack.c.bf16 %v2179_v3, %v2178_v63 }
 0x7e1   : > { %v1647_v40 = vsel %vm765_vm1, %v1640_v39, 0.0 }
 0x7e2   : > { %1648 = vadd.xlane.f32.xlu1 %v1647_v40  ;;  %4554 = vmatpush3.bf16.msra.mxu1 %v4553_v10  ;;  %v4559_v40 = vpack.c.bf16 %v1784_v38, %v1783_v37 }
 0x7e3   : > { %4555 = vmatprep.subr.bf16.mxu1 %v5306_v2 }
 0x867   : > { %v1643_v41 = vpop.xlane.xlu1 %1642 }
 0x868   : > { %4773 = vrcp.f32 %v1643_v41  ;;  %v1754_v41 = vrot.slane %v1753_v30, 1 }
 0x86a   : > { %v1755_v45 = vadd.f32 %v1754_v41, %v1753_v30 }
 0x86b   : > { %v1646_v0 = vpop.xlane.xlu0 %1645 }
 0x86c   : > { %4775 = vrcp.f32 %v1646_v0  ;;  %v1793_v0 = vld [vmem:[%s6557_s18 + $0x60] sm:$0xff] }
 0x86f   : > { %v1649_v1 = vpop.xlane.xlu1 %1648 }
 0x870   : > { %4777 = vrcp.f32 %v1649_v1  ;;  %v4568_v1 = vpack.c.bf16 %v1794_v44, %v1793_v0 }
 0x872   : > { %v4774_v47 = vpop.eup %4773 }
 0x873   : > { %v1651_v51 = vmul.f32 %v4774_v47, %v1638_v29  ;;  %v4556_v29 = vpack.c.bf16 %v1782_v22, %v1781_v43  ;;  %v1795_v47 = vld [vmem:[%s6557_s18 + $0x70] sm:$0xff] }
 0x875   : > { %4407 = vmatmul.mubr.msk.f32.vlgmr.msra.gmra.mrb[24].mxu0 %vm765_vm1, %v1651_v51 }
 0x876   : > { %v4776_v36 = vpop.eup %4775  ;;  %4409 = vmatprep.mubr.msk.f32.mxu0 %vm5307_vm0, %v5308_v4  ;;  %4563 = vmatpush3.bf16.msra.mxu0 %v4562_v48  ;;  %v1796_v48 = vld [vmem:[%s6557_s18 + $0x78] sm:$0xff] }
 0x877   : > { %v1653_v56 = vmul.f32 %v4776_v36, %v1639_v32  ;;  %4564 = vmatprep.subr.bf16.mxu0 %v5306_v2  ;;  %v4571_v49 = vpack.c.bf16 %v1796_v48, %v1795_v47  ;;  %v2094_v36 = vld [vmem:[%s6558_s22 + $0x8] sm:$0xff] }
 0x879   : > { %4410 = vmatmul.mubr.msk.f32.gmra.mrb[26].mxu0 %vm765_vm1, %v1653_v56 }
 0x87a   : > { %v4778_v57 = vpop.eup %4777  ;;  %4412 = vmatprep.mubr.msk.f32.mxu0 %vm5307_vm0, %v5308_v4  ;;  %4566 = vmatpush3.bf16.msra.mxu0 %v4565_v33  ;;  %v4574_v33 = vpack.c.bf16 %v2094_v36, %v2093_v53 }
 0x87b   : > { %v1655_v59 = vmul.f32 %v4778_v57, %v1640_v39  ;;  %4573 = vmatprep.subr.bf16.mxu0 %v5306_v2  ;;  %v2097_v57 = vld [vmem:[%s6558_s22 + $0x20] sm:$0xff] }
 0x87d   : > { %4413 = vmatmul.mubr.msk.f32.gmra.mrb[28].mxu0 %vm765_vm1, %v1655_v59  ;;  %v4580_v59 = vpack.c.bf16 %v2098_v58, %v2097_v57 }
 0x87e   : > { %4445 = vmatprep.mubr.msk.f32.mxu0 %vm5307_vm0, %v5308_v4 }
 0x881   : > { %4446 = vmatmul.mubr.msk.f32.vlgmr.msra.gmra.mrb[30].mxu0 %vm1376_vm9, %v1764_v60  ;;  %v2099_v60 = vld [vmem:[%s6558_s22 + $0x30] sm:$0xff] }
 0x882   : > { %4475 = vmatprep.mubr.msk.f32.mxu0 %vm5307_vm0, %v5308_v4  ;;  %4575 = vmatpush3.bf16.msra.mxu0 %v4574_v33  ;;  %v4583_v62 = vpack.c.bf16 %v2100_v61, %v2099_v60 }
 0x883   : > { %4576 = vmatprep.subr.bf16.mxu0 %v5306_v2 }
 0x948   : > { %v1735_v12 = vpop.f32.mrb[24].mxu0 }
 0x949   : > { %v1736_v13 = vadd.f32 %v1735_v12, %v1659_v50  ;;  %v4408_v14 = vpop.f32.mrb[25].mxu0 }
 0x94b   : > { %v1765_v16 = vsel %vm1376_vm9, %v1736_v13, 0.0 }
 0x94c   : > { %v1766_v17 = vrot.slane %v1765_v16, 4  ;;  %v1740_v6 = vpop.f32.mrb[26].mxu0 }
 0x94d   : > { %v4411_v18 = vpop.f32.mrb[27].mxu0  ;;  %v1741_v8 = vadd.f32 %v1740_v6, %v1659_v50 }
 0x94e   : > { %v1767_v7 = vadd.f32 %v1766_v17, %v1765_v16 }
 0x94f   : > { %v1772_v23 = vsel %vm1376_vm9, %v1741_v8, 0.0  ;;  %v2102_v8 = vrot.slane %v1797_v15, 1 }
 0x950   : > { %v1768_v35 = vrot.slane %v1767_v7, 2  ;;  %v1745_v20 = vpop.f32.mrb[28].mxu0 }
 0x951   : > { %v1746_v34 = vadd.f32 %v1745_v20, %v1659_v50  ;;  %v4414_v21 = vpop.f32.mrb[29].mxu0 }
 0x952   : > { %v1769_v54 = vadd.f32 %v1768_v35, %v1767_v7 }
 0x953   : > { %v1773_v24 = vsel %vm1376_vm9, %v1746_v34, 0.0 }
 0x954   : > { %v1770_v25 = vrot.slane %v1769_v54, 1  ;;  %v1774_v26 = vadd.f32 %v1773_v24, %v1772_v23  ;;  %v6092_v27 = vpop.f32.mrb[30].mxu0 }
 0x955   : > { %v4447_v28 = vpop.f32.mrb[31].mxu0 }
 0x956   : > { %v1771_v31 = vadd.f32 %v1770_v25, %v1769_v54  ;;  %v1775_v32 = vrot.slane %v1774_v26, 4 }
 0x958   : > { %v1776_v39 = vadd.f32 %v1775_v32, %v1774_v26  ;;  %4424 = vmatmul.mubr.msk.f32.vlgmr.msra.gmra.mrb[24].mxu1 %vm1376_vm9, %v1771_v31 }
 0x959   : > { %4557 = vmatpush3.bf16.msra.mxu1 %v4556_v29  ;;  %4434 = vmatprep.mubr.msk.f32.mxu1 %vm5307_vm0, %v5308_v4 }
 0x95a   : > { %v1777_v42 = vrot.slane %v1776_v39, 2  ;;  %4558 = vmatprep.subr.bf16.mxu1 %v5306_v2 }
 0x95c   : > { %v1778_v46 = vadd.f32 %v1777_v42, %v1776_v39 }
 0x95d   : > { %4560 = vmatpush3.bf16.msra.mxu1 %v4559_v40 }
 0x95e   : > { %4567 = vmatprep.subr.bf16.mxu1 %v5306_v2  ;;  %v1779_v51 = vrot.slane %v1778_v46, 1 }
 0x960   : > { %4435 = vmatmul.mubr.msk.f32.vlgmr.msra.gmra.mrb[26].mxu1 %vm1376_vm9, %v1755_v45  ;;  %v1780_v52 = vadd.f32 %v1779_v51, %v1778_v46 }
 0x961   : > { %4569 = vmatpush3.bf16.msra.mxu1 %v4568_v1  ;;  %4456 = vmatprep.mubr.msk.f32.mxu1 %vm5307_vm0, %v5308_v4 }
 0x962   : > { %4570 = vmatprep.subr.bf16.mxu1 %v5306_v2 }
 0x965   : > { %4572 = vmatpush3.bf16.msra.mxu1 %v4571_v49 }
 0x966   : > { %4585 = vmatprep.subr.bf16.mxu1 %v5306_v2 }
 0x968   : > { %4457 = vmatmul.mubr.msk.f32.vlgmr.msra.gmra.mrb[28].mxu1 %vm1376_vm9, %v1780_v52 }
 0x969   : > { %4486 = vmatprep.mubr.msk.f32.mxu1 %vm5307_vm0, %v5308_v4  ;;  %v2096_v4 = vld [vmem:[%s6558_s22 + $0x18] sm:$0xff]  ;;  %4587 = vmatpush3.bf16.msra.mxu1 %v4586_v9  ;;  %vm2258_vm0 = vcmask 122880  }
 0x96a   : > { %v4577_v56 = vpack.c.bf16 %v2096_v4, %v2095_v55  ;;  %4588 = vmatprep.subr.bf16.mxu1 %v5306_v2 }
 0x96c   : > { %4578 = vmatpush3.bf16.msra.mxu0 %v4577_v56 }
 0x96d   : > { %4579 = vmatprep.subr.bf16.mxu0 %v5306_v2 }
 0x970   : > { %4581 = vmatpush3.bf16.msra.mxu0 %v4580_v59 }
 0x971   : > { %4582 = vmatprep.subr.bf16.mxu0 %v5306_v2  ;;  %v2181_v2 = vld [vmem:[%s6559_s12 + $0x18] sm:$0xff] }
 0x972   : > { %v4589_v7 = vpack.c.bf16 %v2181_v2, %v2180_v19 }
 0x974   : > { %4584 = vmatpush3.bf16.msra.mxu0 %v4583_v62  ;;  %4590 = vmatpush3.bf16.msra.mxu1 %v4589_v7 }
 0xa2b   : > { %v1867_v10 = vpop.f32.mrb[24].mxu1 }
 0xa2c   : > { %v4425_v50 = vpop.f32.mrb[25].mxu1 }
 0xa33   : > { %v1940_v11 = vpop.f32.mrb[26].mxu1 }
 0xa34   : > { %v1941_v12 = vadd.f32 %v1940_v11, %v1867_v10  ;;  %v4436_v13 = vpop.f32.mrb[27].mxu1 }
 0xa36   : > { %v2017_v14 = vadd.f32 %v6092_v27, %v1941_v12 }
 0xa3b   : > { %v2087_v16 = vpop.f32.mrb[28].mxu1 }
 0xa3c   : > { %v2091_v17 = vadd.f32 %v2087_v16, %v2017_v14  ;;  %v4458_v6 = vpop.f32.mrb[29].mxu1 }
 0xa3e   : > { %v2092_v18 = vadd.f32 %v2091_v17, %v1797_v15 }
 0xa40   : > { %4476 = vmatmul.mubr.msk.f32.vlgmr.msra.gmra.mrb[32].mxu0 %vm969_vm3, %v2092_v18 }
 0xb13   : > { %v2173_v35 = vpop.f32.mrb[32].mxu0 }
 0xb14   : > { %v2174_v20 = vadd.f32 %v2173_v35, %v2102_v8  ;;  %v4477_v34 = vpop.f32.mrb[33].mxu0 }
 0xb16   : > { %v2177_v21 = vmax.f32 %v2174_v20, 0.0 }
 0xb18   : > { %4487 = vmatmul.mubr.msk.f32.vlgmr.msra.gmra.mrb[30].mxu1 %vm1376_vm9, %v2177_v21 }
 0xbeb   : > { %v2253_v54 = vpop.f32.mrb[30].mxu1 }
 0xbec   : > { %v2254_v43 = vadd.f32 %v2253_v54, %v2182_v5  ;;  %v4488_v22 = vpop.f32.mrb[31].mxu1 }
 0xbee   : > { %v2257_v23 = vmax.f32 %v2254_v43, 0.0 }
 0xbf0   : > { %2259 = vst.msk [vmem:[#allocation2] sm:$0x1] %vm2258_vm0, %v2257_v23 }
 0xbf1 PF: > { %v4779_v24 = vld [vmem:[%s5793_s20 + $0x4] ss:$148 sps:$4 sm:$0xff]   ;;  %v4781_v25 = vld [vmem:[%s5793_s20 + $0xc] ss:$148 sps:$4 sm:$0xff]   ;;  %v5311_v26 = vmov 0   ;;  %vm2681_vm1 = vcmask 130048  }
 0xbf2   : > { %2717 = vmatprep.mubr.bf16.mxu0 %v5311_v26  ;;  %2758 = vmatprep.mubr.bf16.mxu1 %v5311_v26  ;;  %v4783_v27 = vld [vmem:[%s5793_s20] ss:$148 sps:$4 sm:$0xff]   ;;  %v4784_v28 = vld [vmem:[%s5793_s20 + $0x8] ss:$148 sps:$4 sm:$0xff]   ;;  %v4785_v31 = vld [vmem:[%s5793_s20 + $0x10] ss:$148 sps:$4 sm:$0xff]  }
 0xbf3   : > { %2685 = vmatprep.subr.bf16.mxu0 %v4779_v24  ;;  %2726 = vmatprep.subr.bf16.mxu1 %v4781_v25  ;;  %v4787_v32 = vld [vmem:[%s5793_s20 + $0x14] ss:$148 sps:$4 sm:$0xff]   ;;  %v4788_v37 = vld [vmem:[%s5793_s20 + $0x18] ss:$148 sps:$4 sm:$0xff]   ;;  %v4790_v38 = vld [vmem:[%s5793_s20 + $0x1c] ss:$148 sps:$4 sm:$0xff]  }
 0xbf4   : > { %2686 = vmatpush1.bf16.msra.mxu0 %v4783_v27  ;;  %2727 = vmatpush1.bf16.msra.mxu1 %v4784_v28  ;;  %v4793_v39 = vld [vmem:[%s5793_s20 + $0x24] ss:$148 sps:$4 sm:$0xff]   ;;  %v4796_v40 = vld [vmem:[%s5793_s20 + $0x2c] ss:$148 sps:$4 sm:$0xff]   ;;  %v4794_v42 = vld [vmem:[%s5793_s20 + $0x28] ss:$148 sps:$4 sm:$0xff]  }
 0xbf5   : > { %2767 = vmatprep.subr.bf16.mxu0 %v4787_v32  ;;  %2808 = vmatprep.subr.bf16.mxu1 %v4790_v38  ;;  %v4791_v41 = vld [vmem:[%s5793_s20 + $0x20] ss:$148 sps:$4 sm:$0xff]   ;;  %v4802_v44 = vld [vmem:[%s5793_s20 + $0x3c] ss:$148 sps:$4 sm:$0xff]   ;;  %v4800_v45 = vld [vmem:[%s5793_s20 + $0x38] ss:$148 sps:$4 sm:$0xff]  }
 0xbf6   : > { %v4799_v0 = vld [vmem:[%s5793_s20 + $0x34] ss:$148 sps:$4 sm:$0xff]   ;;  %v4797_v1 = vld [vmem:[%s5793_s20 + $0x30] ss:$148 sps:$4 sm:$0xff]   ;;  %v4808_v47 = vld [vmem:[%s5793_s20 + $0x4c] ss:$148 sps:$4 sm:$0xff]  }
 0xbf7   : > { %v2260_v29 = vld [vmem:[#allocation2] sm:$0x1]  ;;  %v4805_v46 = vld [vmem:[%s5793_s20 + $0x44] ss:$148 sps:$4 sm:$0xff]   ;;  %v4820_v55 = vld [vmem:[%s5793_s20 + $0x6c] ss:$148 sps:$4 sm:$0xff]  }
 0xbf8   : > { %v6174_v30 = vpack.c.bf16 %v2260_v29, %v2260_v29  ;;  %v4803_v48 = vld [vmem:[%s5793_s20 + $0x40] ss:$148 sps:$4 sm:$0xff]   ;;  %v4806_v49 = vld [vmem:[%s5793_s20 + $0x48] ss:$148 sps:$4 sm:$0xff]   ;;  %v4809_v53 = vld [vmem:[%s5793_s20 + $0x50] ss:$148 sps:$4 sm:$0xff]  }
 0xbf9   : > { %v4811_v51 = vld [vmem:[%s5793_s20 + $0x54] ss:$148 sps:$4 sm:$0xff]   ;;  %v4814_v52 = vld [vmem:[%s5793_s20 + $0x5c] ss:$148 sps:$4 sm:$0xff]   ;;  %v4812_v36 = vld [vmem:[%s5793_s20 + $0x58] ss:$148 sps:$4 sm:$0xff]  }
 0xbfa   : > { %4122 = vmatmul.mubr.msk.bf16.vlgmr.msra.gmra.mrb[0].mxu0 %vm2681_vm1, %v6174_v30  ;;  %4123 = vmatmul.mubr.msk.bf16.vlgmr.msra.gmra.mrb[0].mxu1 %vm2681_vm1, %v6174_v30  ;;  %v4817_v33 = vld [vmem:[%s5793_s20 + $0x64] ss:$148 sps:$4 sm:$0xff]   ;;  %v4815_v4 = vld [vmem:[%s5793_s20 + $0x60] ss:$148 sps:$4 sm:$0xff]   ;;  %v4818_v56 = vld [vmem:[%s5793_s20 + $0x68] ss:$148 sps:$4 sm:$0xff]  }
 0xbfb   : > { %2768 = vmatpush1.bf16.msra.mxu0 %v4785_v31  ;;  %2809 = vmatpush1.bf16.msra.mxu1 %v4788_v37  ;;  %v4823_v57 = vld [vmem:[%s5793_s20 + $0x74] ss:$148 sps:$4 sm:$0xff]   ;;  %v4826_v58 = vld [vmem:[%s5793_s20 + $0x7c] ss:$148 sps:$4 sm:$0xff]   ;;  %v4824_v60 = vld [vmem:[%s5793_s20 + $0x78] ss:$148 sps:$4 sm:$0xff]  }
 0xbfc   : > { %2799 = vmatprep.mubr.bf16.mxu0 %v5311_v26  ;;  %2840 = vmatprep.mubr.bf16.mxu1 %v5311_v26  ;;  %v4821_v59 = vld [vmem:[%s5793_s20 + $0x70] ss:$148 sps:$4 sm:$0xff]   ;;  %v4832_v62 = vld [vmem:[%s5793_s20 + $0x8c] ss:$148 sps:$4 sm:$0xff]   ;;  %v4830_v3 = vld [vmem:[%s5793_s20 + $0x88] ss:$148 sps:$4 sm:$0xff]  }
 0xbfd   : > { %2849 = vmatprep.subr.bf16.mxu0 %v4793_v39  ;;  %2890 = vmatprep.subr.bf16.mxu1 %v4796_v40  ;;  %v4829_v61 = vld [vmem:[%s5793_s20 + $0x84] ss:$148 sps:$4 sm:$0xff]   ;;  %v4827_v63 = vld [vmem:[%s5793_s20 + $0x80] ss:$148 sps:$4 sm:$0xff]   ;;  %v5312_v9 = vmov 0.0   ;;  %vm5313_vm3 = vmmov 0  }
 0xbfe   : > { %v4833_v10 = vld [vmem:[%s5793_s20 + $0x90] ss:$148 sps:$4 sm:$0xff]   ;;  %s5314_s19 = smov [#allocation22]   ;;  %p6560_p11 = scmp.eq.s32.totalorder %s5436_s0, 7 }
 0xbff   : > { %s3812_s17 = sshll.u32 %s5314_s19, 4  ;;  %s3813_s17 = int_to_ptr.vmem [resolvable:$true] %s3812_s17 }
 0xc00   : > { %s5146_s14 = scalar_lea.vmem %s3813_s17, 128  ;;  %p5153_p4 = scmp.lt.s32.totalorder %s3813_s17, %s3813_s17 }
 0xc01   : > { %p5147_p12 = scmp.ne.s32.totalorder %s3813_s17, %s5146_s14  ;;  %p5154_p0 = scmp.lt.s32.totalorder %s5146_s14, %s5146_s14 }
 0xc02   : > { %4124 = vmatmul.mubr.msk.bf16.vlgmr.msra.gmra.mrb[4].mxu0 %vm2681_vm1, %v6174_v30  ;;  %4125 = vmatmul.mubr.msk.bf16.vlgmr.msra.gmra.mrb[4].mxu1 %vm2681_vm1, %v6174_v30 }
 0xc03   : > { %2850 = vmatpush1.bf16.msra.mxu0 %v4791_v41  ;;  %2891 = vmatpush1.bf16.msra.mxu1 %v4794_v42  ;;  %p5148_p2 = pnand %p5147_p12, %p6560_p11  ;;  %p5155_p5 = por %p5154_p0, %p5153_p4 }
 0xc04   : > { %2881 = vmatprep.mubr.bf16.mxu0 %v5311_v26  ;;  %2922 = vmatprep.mubr.bf16.mxu1 %v5311_v26 }
 0xc05   : > { %2931 = vmatprep.subr.bf16.mxu0 %v4799_v0  ;;  %2972 = vmatprep.subr.bf16.mxu1 %v4802_v44  ;;  %p5149_p10 = pneg %p5148_p2 }
 0xc07   : > { %p5156_p1 = pnand %p5155_p5, %p5149_p10 }
 0xc0a   : > { %4126 = vmatmul.mubr.msk.bf16.vlgmr.msra.gmra.mrb[8].mxu0 %vm2681_vm1, %v6174_v30  ;;  %4127 = vmatmul.mubr.msk.bf16.vlgmr.msra.gmra.mrb[8].mxu1 %vm2681_vm1, %v6174_v30 }
 0xc0b   : > { %2932 = vmatpush1.bf16.msra.mxu0 %v4797_v1  ;;  %2973 = vmatpush1.bf16.msra.mxu1 %v4800_v45 }
 0xc0c   : > { %2963 = vmatprep.mubr.bf16.mxu0 %v5311_v26  ;;  %3004 = vmatprep.mubr.bf16.mxu1 %v5311_v26 }
 0xc0d   : > { %3013 = vmatprep.subr.bf16.mxu0 %v4805_v46  ;;  %3054 = vmatprep.subr.bf16.mxu1 %v4808_v47 }
 0xc12   : > { %4128 = vmatmul.mubr.msk.bf16.vlgmr.msra.gmra.mrb[12].mxu0 %vm2681_vm1, %v6174_v30  ;;  %4129 = vmatmul.mubr.msk.bf16.vlgmr.msra.gmra.mrb[12].mxu1 %vm2681_vm1, %v6174_v30 }
 0xc13   : > { %3014 = vmatpush1.bf16.msra.mxu0 %v4803_v48  ;;  %3055 = vmatpush1.bf16.msra.mxu1 %v4806_v49 }
 0xc14   : > { %3045 = vmatprep.mubr.bf16.mxu0 %v5311_v26  ;;  %3086 = vmatprep.mubr.bf16.mxu1 %v5311_v26 }
 0xc15   : > { %3095 = vmatprep.subr.bf16.mxu0 %v4811_v51  ;;  %3136 = vmatprep.subr.bf16.mxu1 %v4814_v52 }
 0xc1a   : > { %4130 = vmatmul.mubr.msk.bf16.vlgmr.msra.gmra.mrb[16].mxu0 %vm2681_vm1, %v6174_v30  ;;  %4131 = vmatmul.mubr.msk.bf16.vlgmr.msra.gmra.mrb[16].mxu1 %vm2681_vm1, %v6174_v30 }
 0xc1b   : > { %3096 = vmatpush1.bf16.msra.mxu0 %v4809_v53  ;;  %3137 = vmatpush1.bf16.msra.mxu1 %v4812_v36 }
 0xc1c   : > { %3127 = vmatprep.mubr.bf16.mxu0 %v5311_v26  ;;  %3168 = vmatprep.mubr.bf16.mxu1 %v5311_v26 }
 0xc1d   : > { %3177 = vmatprep.subr.bf16.mxu0 %v4817_v33  ;;  %3218 = vmatprep.subr.bf16.mxu1 %v4820_v55 }
 0xc22   : > { %4132 = vmatmul.mubr.msk.bf16.vlgmr.msra.gmra.mrb[20].mxu0 %vm2681_vm1, %v6174_v30  ;;  %4133 = vmatmul.mubr.msk.bf16.vlgmr.msra.gmra.mrb[20].mxu1 %vm2681_vm1, %v6174_v30 }
 0xc23   : > { %3178 = vmatpush1.bf16.msra.mxu0 %v4815_v4  ;;  %3219 = vmatpush1.bf16.msra.mxu1 %v4818_v56 }
 0xc24   : > { %3209 = vmatprep.mubr.bf16.mxu0 %v5311_v26  ;;  %3250 = vmatprep.mubr.bf16.mxu1 %v5311_v26 }
 0xc25   : > { %3259 = vmatprep.subr.bf16.mxu0 %v4823_v57  ;;  %3300 = vmatprep.subr.bf16.mxu1 %v4826_v58 }
 0xc2a   : > { %4134 = vmatmul.mubr.msk.bf16.vlgmr.msra.gmra.mrb[24].mxu0 %vm2681_vm1, %v6174_v30  ;;  %4135 = vmatmul.mubr.msk.bf16.vlgmr.msra.gmra.mrb[24].mxu1 %vm2681_vm1, %v6174_v30 }
 0xc2b   : > { %3260 = vmatpush1.bf16.msra.mxu0 %v4821_v59  ;;  %3301 = vmatpush1.bf16.msra.mxu1 %v4824_v60 }
 0xc2c   : > { %3291 = vmatprep.mubr.bf16.mxu0 %v5311_v26  ;;  %3332 = vmatprep.mubr.bf16.mxu1 %v5311_v26 }
 0xc2d   : > { %3341 = vmatprep.subr.bf16.mxu0 %v4829_v61  ;;  %3382 = vmatprep.subr.bf16.mxu1 %v4832_v62 }
 0xc32   : > { %4136 = vmatmul.mubr.msk.bf16.vlgmr.msra.gmra.mrb[28].mxu0 %vm2681_vm1, %v6174_v30  ;;  %4137 = vmatmul.mubr.msk.bf16.vlgmr.msra.gmra.mrb[28].mxu1 %vm2681_vm1, %v6174_v30 }
 0xc33   : > { %3342 = vmatpush1.bf16.msra.mxu0 %v4827_v63  ;;  %3383 = vmatpush1.bf16.msra.mxu1 %v4830_v3 }
 0xc34   : > { %3373 = vmatprep.mubr.bf16.mxu0 %v5311_v26  ;;  %3414 = vmatprep.mubr.bf16.mxu1 %v5311_v26 }
 0xc35   : > { %4489 = vmatprep.subr.bf16.mxu0 %v5312_v9 }
 0xc3a   : > { %4138 = vmatmul.mubr.msk.bf16.vlgmr.msra.gmra.mrb[32].mxu0 %vm2681_vm1, %v6174_v30  ;;  %4139 = vmatmul.mubr.msk.bf16.vlgmr.msra.gmra.mrb[32].mxu1 %vm2681_vm1, %v6174_v30 }
 0xc3b   : > { %4490 = vmatpush3.bf16.msra.mxu0 %v4833_v10  ;;  %4491 = vmatprep.mubr.msk.bf16.mxu0 %vm5313_vm3, %v5312_v9 }
 0xc42   : > { %4492 = vmatmul.mubr.msk.bf16.vlgmr.msra.gmra.mrb[36].mxu0 %vm2681_vm1, %v6174_v30 }
 0xc43   : > { %5159 = shalt.err (!%p5156_p1)
}
 0xc44   : > { %s6561_s25 = sld [smem:[#allocation51_spill]]  ;;  %p6562_p9 = pmov %p6560_p11 }
 0xc4a   : > { %s5160_s9 = scalar_lea.hbm %s6561_s25, 128 }
 0xc4b   : > { %p5161_p3 = scmp.ne.s32.totalorder %s6561_s25, %s5160_s9  ;;  %p5166_p13 = scmp.lt.u32.totalorder %s5160_s9, %s6561_s25 }
 0xc4d   : > { %p5162_p8 = pnand %p5161_p3, %p6562_p9 }
 0xc4f   : > { %p5163_p7 = pneg %p5162_p8 }
 0xc51   : > { %p5168_p6 = pnand %p5166_p13, %p5163_p7 }
 0xc53   : > { %5171 = shalt.err (!%p5168_p6)
}
 0xc54   : > { %p6563_p12 = pmov %p6562_p9  ;;  %s5315_s19 = smov [#allocation24]  }
 0xc55   : > { %s3822_s14 = sshll.u32 %s5315_s19, 4  ;;  %p6564_p2 = pmov %p6562_p9  ;;  %s3823_s14 = int_to_ptr.vmem [resolvable:$true] %s3822_s14 }
 0xc56   : > { %4637 = dma.vmem_to_hbm [thread:$0]  (%p6563_p12), %s3813_s17, 128, %s6561_s25, [#allocation23]  }
 0xc57   : > { %s5172_s20 = scalar_lea.vmem %s3823_s14, 256  ;;  %p5179_p0 = scmp.lt.s32.totalorder %s3823_s14, %s3823_s14 }
 0xc58   : > { %p5173_p11 = scmp.ne.s32.totalorder %s3823_s14, %s5172_s20  ;;  %p5180_p5 = scmp.lt.s32.totalorder %s5172_s20, %s5172_s20 }
 0xc5a   : > { %p5174_p10 = pnand %p5173_p11, %p6564_p2  ;;  %p5181_p1 = por %p5180_p5, %p5179_p0 }
 0xc5c   : > { %p5175_p4 = pneg %p5174_p10 }
 0xc5e   : > { %p5182_p3 = pnand %p5181_p1, %p5175_p4 }
 0xc60   : > { %5185 = shalt.err (!%p5182_p3)
}
 0xc61   : > { %s6565_s10 = sld [smem:[#allocation52_spill]]  ;;  %p6566_p8 = pmov %p6564_p2 }
 0xc67   : > { %s5186_s26 = scalar_lea.hbm %s6565_s10, 256 }
 0xc68   : > { %p5187_p9 = scmp.ne.s32.totalorder %s6565_s10, %s5186_s26  ;;  %p5192_p6 = scmp.lt.u32.totalorder %s5186_s26, %s6565_s10 }
 0xc6a   : > { %p5188_p7 = pnand %p5187_p9, %p6566_p8 }
 0xc6c   : > { %p5189_p13 = pneg %p5188_p7 }
 0xc6e   : > { %p5194_p12 = pnand %p5192_p6, %p5189_p13 }
 0xc70   : > { %5197 = shalt.err (!%p5194_p12)
}
 0xc71   : > { %s5316_s24 = smov 128   ;;  %s5317_s19 = smov 8   ;;  %v2496_v50 = vlaneseq  ;;  %v2300_v14 = vld [vmem:[%s5800_s13] sm:$0xff]  ;;  %v5318_v17 = vmov 1966171168   ;;  %v2301_v57 = vld [vmem:[%s5800_s13 + $0x8] sm:$0xff] }
 0xc72   : > { %p6567_p11 = pmov %p6564_p2  ;;  %v3542_v6 = vunpack.c.l.s4 %v5318_v17  ;;  %s3801_s9 = sshll.u32 %s5802_s21, 4  ;;  %s6401_s9 = int_to_ptr.vmem [resolvable:$true] %s3801_s9 }
 0xc73   : > { %v2497_v11 = vshrl.u32 %v2496_v50, 7  ;;  %vm3783_vm6 = vcmp.lt.s32.totalorder %v2496_v50, 640  ;;  %s6569_s17 = sld [smem:[#allocation50_spill]]  ;;  %s3787_s27 = scalar_lea.sflag [#allocation5], %s5790_s6 }
 0xc74   : > { %4639 = dma.vmem_to_hbm [thread:$0]  (%p6567_p11), %s3823_s14, 256, %s6565_s10, [#allocation23], %s5316_s24, %s5316_s24, %s5317_s19   ;;  %v3543_v20 = vunpack.c.0.s8 %v3542_v6 }
 0xc75   : > { %v6300_v12 = vsub.s32 0, %v2497_v11  ;;  %v6302_v13 = vsub.s32 2, %v2497_v11  ;;  %v6305_v15 = vsub.s32 1, %v2497_v11  ;;  %v6307_v16 = vsub.s32 3, %v2497_v11  ;;  %s4150_s14 = smul.u32 592, %s5436_s0  ;;  %s5198_s24 = scalar_lea.vmem %s6401_s9, 592 }
 0xc76   : > { %v6313_v43 = vsub.s32 4, %v2497_v11  ;;  %v6315_v22 = vsub.s32 6, %v2497_v11  ;;  %v6317_v27 = vsub.s32 5, %v2497_v11  ;;  %v6319_v28 = vsub.s32 7, %v2497_v11  ;;  %p5199_p2 = scmp.ne.s32.totalorder %s6401_s9, %s5198_s24  ;;  %s5319_s19 = smov [#allocation21]  }
 0xc77   : > { %v2499_v18 = vrot.slane %v2300_v14, %v6300_v12  ;;  %v2507_v19 = vrot.slane %v2300_v14, %v6302_v13  ;;  %v2503_v2 = vrot.slane %v2300_v14, %v6305_v15  ;;  %v2511_v7 = vrot.slane %v2300_v14, %v6307_v16  ;;  %s5202_s20 = sshll.u32 %s5319_s19, 4  ;;  %s5203_s20 = int_to_ptr.vmem [resolvable:$false] %s5202_s20 }
 0xc78   : > { %v6321_v38 = vsub.s32 %v3543_v20, %v2497_v11  ;;  %v2515_v40 = vrot.slane %v2300_v14, %v6313_v43  ;;  %v2523_v41 = vrot.slane %v2300_v14, %v6315_v22  ;;  %v2519_v44 = vrot.slane %v2300_v14, %v6317_v27  ;;  %s5204_s4 = scalar_lea.vmem %s5203_s20, 1184  ;;  %p5205_p5 = scmp.lt.s32.totalorder %s6401_s9, %s5203_s20 }
 0xc79   : > { %v2527_v1 = vrot.slane %v2300_v14, %v6319_v28  ;;  %v2531_v3 = vrot.slane %v2301_v57, %v6300_v12  ;;  %v2539_v9 = vrot.slane %v2301_v57, %v6302_v13  ;;  %v2535_v14 = vrot.slane %v2301_v57, %v6305_v15  ;;  %s6399_s23 = scalar_lea.hbm %s6569_s17, %s4150_s14  ;;  %p5206_p1 = scmp.lt.s32.totalorder %s5204_s4, %s5198_s24 }
 0xc7a   : > { %v2543_v17 = vrot.slane %v2301_v57, %v6307_v16 }
 0xc7b   : > { %p5207_p3 = por %p5206_p1, %p5205_p5 }
 0xccd   : > { %v2719_v8 = vpop.f32.mrb[0].mxu0  ;;  %v2760_v35 = vpop.f32.mrb[0].mxu1 }
 0xcce   : > { %v2720_v34 = vadd.f32 %v2719_v8, %v2499_v18  ;;  %v2761_v21 = vadd.f32 %v2760_v35, %v2507_v19  ;;  %v2721_v5 = vpop.f32.mrb[1].mxu0  ;;  %v2762_v54 = vpop.f32.mrb[1].mxu1 }
 0xccf   : > { %v2722_v23 = vadd.f32 %v2721_v5, %v2503_v2  ;;  %v2763_v24 = vadd.f32 %v2762_v54, %v2511_v7  ;;  %v2723_v25 = vpop.f32.mrb[2].mxu0  ;;  %v2764_v26 = vpop.f32.mrb[2].mxu1 }
 0xcd0   : > { %v3463_v29 = vmax.f32 %v2720_v34, 0.0  ;;  %v3465_v30 = vmax.f32 %v2761_v21, 0.0  ;;  %v2724_v31 = vpop.f32.mrb[3].mxu0  ;;  %v2765_v32 = vpop.f32.mrb[3].mxu1 }
 0xcd1   : > { %v3464_v37 = vmax.f32 %v2722_v23, 0.0  ;;  %v3466_v39 = vmax.f32 %v2763_v24, 0.0 }
 0xcd3   : > { %v3537_v42 = vcombine.low %v3463_v29, %v3464_v37  ;;  %v3538_v0 = vcombine.low %v3465_v30, %v3466_v39  ;;  %v2547_v39 = vrot.slane %v2301_v57, %v6313_v43 }
 0xcd5   : > { %v3547_v45 = vrot.slane %v3537_v42, %v6321_v38  ;;  %v3554_v46 = vrot.slane %v3538_v0, %v6321_v38  ;;  %v2801_v47 = vpop.f32.mrb[4].mxu0  ;;  %v2842_v48 = vpop.f32.mrb[4].mxu1 }
 0xcd6   : > { %v2802_v49 = vadd.f32 %v2801_v47, %v2515_v40  ;;  %v2843_v51 = vadd.f32 %v2842_v48, %v2523_v41  ;;  %v2803_v52 = vpop.f32.mrb[5].mxu0  ;;  %v2844_v53 = vpop.f32.mrb[5].mxu1  ;;  %v2555_v40 = vrot.slane %v2301_v57, %v6315_v22  ;;  %v2551_v41 = vrot.slane %v2301_v57, %v6317_v27 }
 0xcd7   : > { %v3569_v36 = vcombine.low %v3547_v45, %v3554_v46  ;;  %v2804_v33 = vadd.f32 %v2803_v52, %v2519_v44  ;;  %v2845_v55 = vadd.f32 %v2844_v53, %v2527_v1  ;;  %v2805_v4 = vpop.f32.mrb[6].mxu0  ;;  %v2846_v56 = vpop.f32.mrb[6].mxu1  ;;  %v2559_v1 = vrot.slane %v2301_v57, %v6319_v28 }
 0xcd8   : > { %v3467_v58 = vmax.f32 %v2802_v49, 0.0  ;;  %v3469_v59 = vmax.f32 %v2843_v51, 0.0  ;;  %v2806_v60 = vpop.f32.mrb[7].mxu0  ;;  %v2847_v61 = vpop.f32.mrb[7].mxu1 }
 0xcd9   : > { %v3468_v62 = vmax.f32 %v2804_v33, 0.0  ;;  %v3470_v63 = vmax.f32 %v2845_v55, 0.0  ;;  %v3577_v30 = vrot.slane %v3569_v36, %v6321_v38 }
 0xcdb   : > { %v3539_v10 = vcombine.low %v3467_v58, %v3468_v62  ;;  %v3540_v11 = vcombine.low %v3469_v59, %v3470_v63  ;;  %v2302_v58 = vld [vmem:[%s5800_s13 + $0x10] sm:$0xff] }
 0xcdd   : > { %v3561_v6 = vrot.slane %v3539_v10, %v6321_v38  ;;  %v3568_v18 = vrot.slane %v3540_v11, %v6321_v38  ;;  %v2883_v19 = vpop.f32.mrb[8].mxu0  ;;  %v2924_v2 = vpop.f32.mrb[8].mxu1 }
 0xcde   : > { %v2884_v7 = vadd.f32 %v2883_v19, %v2531_v3  ;;  %v2925_v8 = vadd.f32 %v2924_v2, %v2539_v9  ;;  %v2885_v35 = vpop.f32.mrb[9].mxu0  ;;  %v2926_v20 = vpop.f32.mrb[9].mxu1  ;;  %v2563_v3 = vrot.slane %v2302_v58, %v6300_v12  ;;  %v2571_v9 = vrot.slane %v2302_v58, %v6302_v13 }
 0xcdf   : > { %v3570_v34 = vcombine.low %v3561_v6, %v3568_v18  ;;  %v2886_v21 = vadd.f32 %v2885_v35, %v2535_v14  ;;  %v2927_v5 = vadd.f32 %v2926_v20, %v2543_v17  ;;  %v2887_v54 = vpop.f32.mrb[10].mxu0  ;;  %v2928_v23 = vpop.f32.mrb[10].mxu1  ;;  %v2567_v14 = vrot.slane %v2302_v58, %v6305_v15 }
 0xce0   : > { %v3471_v24 = vmax.f32 %v2884_v7, 0.0  ;;  %v3473_v25 = vmax.f32 %v2925_v8, 0.0  ;;  %v2888_v26 = vpop.f32.mrb[11].mxu0  ;;  %v2929_v29 = vpop.f32.mrb[11].mxu1  ;;  %v2575_v17 = vrot.slane %v2302_v58, %v6307_v16 }
 0xce1   : > { %v3584_v31 = vrot.slane %v3570_v34, %v6321_v38  ;;  %v3472_v32 = vmax.f32 %v2886_v21, 0.0  ;;  %v3474_v37 = vmax.f32 %v2927_v5, 0.0 }
 0xce3   : > { %v3585_v42 = vcombine.low %v3577_v30, %v3584_v31  ;;  %v3586_v0 = vcombine.low %v3471_v24, %v3472_v32  ;;  %v3587_v44 = vcombine.low %v3473_v25, %v3474_v37 }
 0xce5   : > { %3777 = vst [vmem:[%s5802_s21] sm:$0xff] %v3585_v42  ;;  %v3596_v45 = vrot.slane %v3586_v0, %v6321_v38  ;;  %v3603_v46 = vrot.slane %v3587_v44, %v6321_v38  ;;  %v2965_v47 = vpop.f32.mrb[12].mxu0  ;;  %v3006_v48 = vpop.f32.mrb[12].mxu1 }
 0xce6   : > { %v2966_v49 = vadd.f32 %v2965_v47, %v2547_v39  ;;  %v3007_v51 = vadd.f32 %v3006_v48, %v2555_v40  ;;  %v2967_v52 = vpop.f32.mrb[13].mxu0  ;;  %v3008_v53 = vpop.f32.mrb[13].mxu1  ;;  %v2579_v39 = vrot.slane %v2302_v58, %v6313_v43  ;;  %v2587_v40 = vrot.slane %v2302_v58, %v6315_v22 }
 0xce7   : > { %v3618_v36 = vcombine.low %v3596_v45, %v3603_v46  ;;  %v2968_v33 = vadd.f32 %v2967_v52, %v2551_v41  ;;  %v3009_v55 = vadd.f32 %v3008_v53, %v2559_v1  ;;  %v2969_v4 = vpop.f32.mrb[14].mxu0  ;;  %v3010_v56 = vpop.f32.mrb[14].mxu1  ;;  %v2583_v41 = vrot.slane %v2302_v58, %v6317_v27 }
 0xce8   : > { %v3475_v59 = vmax.f32 %v2966_v49, 0.0  ;;  %v3477_v60 = vmax.f32 %v3007_v51, 0.0  ;;  %v2970_v57 = vpop.f32.mrb[15].mxu0  ;;  %v3011_v61 = vpop.f32.mrb[15].mxu1  ;;  %v2591_v1 = vrot.slane %v2302_v58, %v6319_v28 }
 0xce9   : > { %v3476_v62 = vmax.f32 %v2968_v33, 0.0  ;;  %v3478_v63 = vmax.f32 %v3009_v55, 0.0  ;;  %v3626_v30 = vrot.slane %v3618_v36, %v6321_v38 }
 0xceb   : > { %v3588_v10 = vcombine.low %v3475_v59, %v3476_v62  ;;  %v3589_v11 = vcombine.low %v3477_v60, %v3478_v63  ;;  %v2303_v59 = vld [vmem:[%s5800_s13 + $0x18] sm:$0xff] }
 0xced   : > { %v3610_v6 = vrot.slane %v3588_v10, %v6321_v38  ;;  %v3617_v18 = vrot.slane %v3589_v11, %v6321_v38  ;;  %v3047_v19 = vpop.f32.mrb[16].mxu0  ;;  %v3088_v2 = vpop.f32.mrb[16].mxu1 }
 0xcee   : > { %v3048_v7 = vadd.f32 %v3047_v19, %v2563_v3  ;;  %v3089_v8 = vadd.f32 %v3088_v2, %v2571_v9  ;;  %v3049_v35 = vpop.f32.mrb[17].mxu0  ;;  %v3090_v20 = vpop.f32.mrb[17].mxu1  ;;  %v2595_v3 = vrot.slane %v2303_v59, %v6300_v12  ;;  %v2603_v9 = vrot.slane %v2303_v59, %v6302_v13 }
 0xcef   : > { %v3619_v34 = vcombine.low %v3610_v6, %v3617_v18  ;;  %v3050_v21 = vadd.f32 %v3049_v35, %v2567_v14  ;;  %v3091_v5 = vadd.f32 %v3090_v20, %v2575_v17  ;;  %v3051_v54 = vpop.f32.mrb[18].mxu0  ;;  %v3092_v23 = vpop.f32.mrb[18].mxu1  ;;  %v2599_v14 = vrot.slane %v2303_v59, %v6305_v15 }
 0xcf0   : > { %v3479_v24 = vmax.f32 %v3048_v7, 0.0  ;;  %v3481_v25 = vmax.f32 %v3089_v8, 0.0  ;;  %v3052_v26 = vpop.f32.mrb[19].mxu0  ;;  %v3093_v29 = vpop.f32.mrb[19].mxu1  ;;  %v2607_v17 = vrot.slane %v2303_v59, %v6307_v16 }
 0xcf1   : > { %v3633_v31 = vrot.slane %v3619_v34, %v6321_v38  ;;  %v3480_v32 = vmax.f32 %v3050_v21, 0.0  ;;  %v3482_v37 = vmax.f32 %v3091_v5, 0.0 }
 0xcf3   : > { %v3634_v42 = vcombine.low %v3626_v30, %v3633_v31  ;;  %v3635_v0 = vcombine.low %v3479_v24, %v3480_v32  ;;  %v3636_v44 = vcombine.low %v3481_v25, %v3482_v37 }
 0xcf5   : > { %3778 = vst [vmem:[%s5802_s21 + $0x8] sm:$0xff] %v3634_v42  ;;  %v3645_v45 = vrot.slane %v3635_v0, %v6321_v38  ;;  %v3652_v46 = vrot.slane %v3636_v44, %v6321_v38  ;;  %v3129_v47 = vpop.f32.mrb[20].mxu0  ;;  %v3170_v48 = vpop.f32.mrb[20].mxu1 }
 0xcf6   : > { %v3130_v49 = vadd.f32 %v3129_v47, %v2579_v39  ;;  %v3171_v51 = vadd.f32 %v3170_v48, %v2587_v40  ;;  %v3131_v52 = vpop.f32.mrb[21].mxu0  ;;  %v3172_v53 = vpop.f32.mrb[21].mxu1  ;;  %v2611_v39 = vrot.slane %v2303_v59, %v6313_v43  ;;  %v2619_v40 = vrot.slane %v2303_v59, %v6315_v22 }
 0xcf7   : > { %v3667_v36 = vcombine.low %v3645_v45, %v3652_v46  ;;  %v3132_v33 = vadd.f32 %v3131_v52, %v2583_v41  ;;  %v3173_v55 = vadd.f32 %v3172_v53, %v2591_v1  ;;  %v3133_v4 = vpop.f32.mrb[22].mxu0  ;;  %v3174_v56 = vpop.f32.mrb[22].mxu1  ;;  %v2615_v41 = vrot.slane %v2303_v59, %v6317_v27 }
 0xcf8   : > { %v3483_v60 = vmax.f32 %v3130_v49, 0.0  ;;  %v3485_v57 = vmax.f32 %v3171_v51, 0.0  ;;  %v3134_v58 = vpop.f32.mrb[23].mxu0  ;;  %v3175_v61 = vpop.f32.mrb[23].mxu1  ;;  %v2623_v1 = vrot.slane %v2303_v59, %v6319_v28  ;;  %v2304_v4 = vld [vmem:[%s5800_s13 + $0x20] sm:$0x1f] }
 0xcf9   : > { %v3484_v62 = vmax.f32 %v3132_v33, 0.0  ;;  %v3486_v63 = vmax.f32 %v3173_v55, 0.0  ;;  %v3675_v30 = vrot.slane %v3667_v36, %v6321_v38  ;;  %v2627_v61 = vrot.slane %v2304_v4, %v6300_v12  ;;  %s6568_s13 = sld [smem:[#allocation37_spill]] }
 0xcfb   : > { %v3637_v10 = vcombine.low %v3483_v60, %v3484_v62  ;;  %v3638_v11 = vcombine.low %v3485_v57, %v3486_v63  ;;  %v2635_v62 = vrot.slane %v2304_v4, %v6302_v13 }
 0xcfd   : > { %v3659_v6 = vrot.slane %v3637_v10, %v6321_v38  ;;  %v3666_v18 = vrot.slane %v3638_v11, %v6321_v38  ;;  %v3211_v19 = vpop.f32.mrb[24].mxu0  ;;  %v3252_v2 = vpop.f32.mrb[24].mxu1  ;;  %v2639_v10 = vrot.slane %v2304_v4, %v6307_v16 }
 0xcfe   : > { %v3212_v7 = vadd.f32 %v3211_v19, %v2595_v3  ;;  %v3253_v8 = vadd.f32 %v3252_v2, %v2603_v9  ;;  %v3213_v35 = vpop.f32.mrb[25].mxu0  ;;  %v3254_v20 = vpop.f32.mrb[25].mxu1  ;;  %v2631_v9 = vrot.slane %v2304_v4, %v6305_v15 }
 0xcff   : > { %v3668_v34 = vcombine.low %v3659_v6, %v3666_v18  ;;  %v3214_v21 = vadd.f32 %v3213_v35, %v2599_v14  ;;  %v3255_v5 = vadd.f32 %v3254_v20, %v2607_v17  ;;  %v3215_v54 = vpop.f32.mrb[26].mxu0  ;;  %v3256_v23 = vpop.f32.mrb[26].mxu1  ;;  %p6570_p10 = scmp.ne.s32.totalorder %s6568_s13, 0 }
 0xd00   : > { %v3487_v24 = vmax.f32 %v3212_v7, 0.0  ;;  %v3489_v25 = vmax.f32 %v3253_v8, 0.0  ;;  %v3216_v26 = vpop.f32.mrb[27].mxu0  ;;  %v3257_v29 = vpop.f32.mrb[27].mxu1 }
 0xd01   : > { %v3682_v31 = vrot.slane %v3668_v34, %v6321_v38  ;;  %v3488_v32 = vmax.f32 %v3214_v21, 0.0  ;;  %v3490_v37 = vmax.f32 %v3255_v5, 0.0  ;;  %p5200_p4 = pnand %p5199_p2, %p6570_p10 }
 0xd03   : > { %v3683_v42 = vcombine.low %v3675_v30, %v3682_v31  ;;  %v3684_v0 = vcombine.low %v3487_v24, %v3488_v32  ;;  %v3685_v44 = vcombine.low %v3489_v25, %v3490_v37  ;;  %v2643_v25 = vrot.slane %v2304_v4, %v6313_v43  ;;  %p5201_p0 = pneg %p5200_p4 }
 0xd05   : > { %3779 = vst [vmem:[%s5802_s21 + $0x10] sm:$0xff] %v3683_v42  ;;  %v3694_v45 = vrot.slane %v3684_v0, %v6321_v38  ;;  %v3701_v46 = vrot.slane %v3685_v44, %v6321_v38  ;;  %v3293_v47 = vpop.f32.mrb[28].mxu0  ;;  %v3334_v48 = vpop.f32.mrb[28].mxu1  ;;  %p5208_p9 = pnand %p5207_p3, %p5201_p0 }
 0xd06   : > { %v3294_v49 = vadd.f32 %v3293_v47, %v2611_v39  ;;  %v3335_v51 = vadd.f32 %v3334_v48, %v2619_v40  ;;  %v3295_v52 = vpop.f32.mrb[29].mxu0  ;;  %v3336_v53 = vpop.f32.mrb[29].mxu1 }
 0xd07   : > { %v3716_v22 = vcombine.low %v3694_v45, %v3701_v46  ;;  %v3296_v36 = vadd.f32 %v3295_v52, %v2615_v41  ;;  %v3337_v27 = vadd.f32 %v3336_v53, %v2623_v1  ;;  %v3297_v33 = vpop.f32.mrb[30].mxu0  ;;  %v3338_v55 = vpop.f32.mrb[30].mxu1 }
 0xd08   : > { %v3491_v56 = vmax.f32 %v3294_v49, 0.0  ;;  %v3493_v60 = vmax.f32 %v3335_v51, 0.0  ;;  %v3298_v28 = vpop.f32.mrb[31].mxu0  ;;  %v3339_v59 = vpop.f32.mrb[31].mxu1 }
 0xd09   : > { %v3492_v57 = vmax.f32 %v3296_v36, 0.0  ;;  %v3494_v58 = vmax.f32 %v3337_v27, 0.0  ;;  %v3724_v5 = vrot.slane %v3716_v22, %v6321_v38 }
 0xd0b   : > { %v3686_v63 = vcombine.low %v3491_v56, %v3492_v57  ;;  %v3687_v3 = vcombine.low %v3493_v60, %v3494_v58 }
 0xd0d   : > { %v3708_v11 = vrot.slane %v3686_v63, %v6321_v38  ;;  %v3715_v14 = vrot.slane %v3687_v3, %v6321_v38  ;;  %v3375_v17 = vpop.f32.mrb[32].mxu0  ;;  %v3416_v6 = vpop.f32.mrb[32].mxu1 }
 0xd0e   : > { %v3376_v18 = vadd.f32 %v3375_v17, %v2627_v61  ;;  %v3417_v19 = vadd.f32 %v3416_v6, %v2635_v62  ;;  %v3377_v2 = vpop.f32.mrb[33].mxu0  ;;  %v3418_v7 = vpop.f32.mrb[33].mxu1 }
 0xd0f   : > { %v3717_v8 = vcombine.low %v3708_v11, %v3715_v14  ;;  %v3378_v12 = vadd.f32 %v3377_v2, %v2631_v9  ;;  %v3419_v13 = vadd.f32 %v3418_v7, %v2639_v10  ;;  %v3379_v35 = vpop.f32.mrb[34].mxu0  ;;  %v3420_v20 = vpop.f32.mrb[34].mxu1 }
 0xd10   : > { %v3495_v34 = vmax.f32 %v3376_v18, 0.0  ;;  %v3497_v15 = vmax.f32 %v3417_v19, 0.0  ;;  %v3380_v21 = vpop.f32.mrb[35].mxu0  ;;  %v3421_v16 = vpop.f32.mrb[35].mxu1 }
 0xd11   : > { %v3731_v54 = vrot.slane %v3717_v8, %v6321_v38  ;;  %v3496_v23 = vmax.f32 %v3378_v12, 0.0  ;;  %v3498_v24 = vmax.f32 %v3419_v13, 0.0 }
 0xd13   : > { %v3732_v26 = vcombine.low %v3724_v5, %v3731_v54  ;;  %v3733_v29 = vcombine.low %v3495_v34, %v3496_v23  ;;  %v3734_v30 = vcombine.low %v3497_v15, %v3498_v24 }
 0xd15   : > { %3780 = vst [vmem:[%s5802_s21 + $0x18] sm:$0xff] %v3732_v26  ;;  %v3741_v31 = vrot.slane %v3733_v29, %v6321_v38  ;;  %v3748_v32 = vrot.slane %v3734_v30, %v6321_v38  ;;  %v3457_v37 = vpop.f32.mrb[36].mxu0 }
 0xd16   : > { %v3458_v39 = vadd.f32 %v3457_v37, %v2643_v25  ;;  %v4493_v40 = vpop.f32.mrb[37].mxu0 }
 0xd17   : > { %v3756_v41 = vcombine.low %v3741_v31, %v3748_v32  ;;  %v3460_v42 = vpop.f32.mrb[38].mxu0 }
 0xd18   : > { %v3499_v0 = vmax.f32 %v3458_v39, 0.0  ;;  %v4494_v43 = vpop.f32.mrb[39].mxu0 }
 0xd19   : > { %v3763_v44 = vrot.slane %v3756_v41, %v6321_v38 }
 0xd1a   : > { %v3755_v1 = vrot.slane %v3499_v0, %v6321_v38 }
 0xd1c   : > { %v3770_v45 = vrot.slane %v3755_v1, %v6321_v38 }
 0xd1e   : > { %v3771_v46 = vcombine.low %v3763_v44, %v3770_v45 }
 0xd20   : > { %3785 = vst.msk [vmem:[%s5802_s21 + $0x20] sm:$0x1f] %vm3783_vm6, %v3771_v46 }
 0xd21   : > { %5211 = shalt.err (!%p5208_p9)
}
 0xd22   : > { %s5212_s6 = scalar_lea.hbm %s6399_s23, 592  ;;  %s5216_s26 = scalar_lea.hbm %s6569_s17, 4736 }
 0xd23   : > { %p5213_p8 = scmp.ne.s32.totalorder %s6399_s23, %s5212_s6  ;;  %p5217_p6 = scmp.lt.u32.totalorder %s6399_s23, %s6569_s17 }
 0xd24   : > { %p5218_p12 = scmp.lt.u32.totalorder %s5216_s26, %s5212_s6  ;;  %p5220_p2 = scmp.lt.u32.totalorder %s5212_s6, %s6399_s23 }
 0xd25   : > { %p5214_p7 = pnand %p5213_p8, %p6570_p10 }
 0xd26   : > { %p5219_p11 = por %p5218_p12, %p5217_p6 }
 0xd27   : > { %p5215_p13 = pneg %p5214_p7 }
 0xd28   : > { %p5221_p4 = por %p5220_p2, %p5219_p11 }
 0xd2a   : > { %p5222_p0 = pnand %p5221_p4, %p5215_p13 }
 0xd2c   : > { %5225 = shalt.err (!%p5222_p0)
}
 0xd2d   : > { %4635 = dma.vmem_to_hbm [thread:$0]  (%p6570_p10), %s6401_s9, 592, %s6399_s23, %s3787_s27  }
 0xd2e   : > { %p6571_p5 = scmp.eq.s32.totalorder %s5436_s0, 7 }
 0xd30   : > { %5267 = dma.done.wait (%p6571_p5), [#allocation23], 384   ;;  %p6572_p1 = pmov %p6571_p5 }
 0xd32   : > { %5269 = vsyncadd (%p6572_p1), [#allocation23], 4294966912 }
 0xd33 PF: > { %s6573_s24 = sld [smem:[#allocation33_spill]]  ;;  %s6574_s20 = sld [smem:[#allocation38_spill]] }
 0xd34   : > { %p4707_p3 = scmp.ge.s32.totalorder %s5288_s30, 2 }
 0xd39   : > { %s3845_s4 = sand.u32 1, %s6573_s24   ;;  %p6575_p9 = scmp.ne.s32.totalorder %s6574_s20, 0 }
 0xd3a   : > { %s3846_s6 = scalar_lea.sflag [#allocation5], %s3845_s4 }
 0xd3b   : > { %p4681_p8 = pnand %p4707_p3, %p6575_p9 }
 0xd3d   : > { %5271 = dma.done.wait (!%p4681_p8), %s3846_s6, 592  }
 0xd3e   : > { %5273 = vsyncadd (!%p4681_p8), %s3846_s6, 4294966704  ;;  %s6576_s30 = sld [smem:[#allocation35_spill]]  ;;  %s6577_s13 = sld [smem:[#allocation36_spill]] }
 0xd3f   : > { %s6578_s27 = smov %s5280_s28  ;;  %s6579_s28 = smov %s5284_s29 }
 0xd44   : > { %p38_p10 = scmp.ge.s32.totalorder %s6576_s30, 10   ;;  %s6580_s29 = smov %s6577_s13 }
 0xd46   :  { %40 = sbr.rel (!%p38_p10) target bundleno = 26 (0x1a), region = 197 }
 0xd4d   :  { %3851 = vsyncpa [#allocation4], 1 }
 0xd4e   :  { %3853 = vsyncpa [#allocation4 + $0x1], 1 }
 0xd4f   :  { %3854 = vsyncpa [#allocation7], 1 }
 0xd50   :  { %3855 = vsyncpa [#allocation10], 1 }
 0xd51   :  { %3856 = vsyncpa [#allocation13], 1 }
 0xd52   :  { %3857 = vsyncpa [#allocation16], 1 }
 0xd53   :  { %3858 = vsyncpa [#allocation19], 1 }
 0xd54   :  { %3860 = vsyncpa [#allocation19 + $0x1], 1 }
 0xd55   :  { %3861 = vsyncpa [#allocation5], 1 }
 0xd56   :  { %3863 = vsyncpa [#allocation5 + $0x1], 1 }
 0xd57   :  { %3864 = vsyncpa [#allocation23], 1 }

</bundles_post_ra>
